<compile_context>
chip_gen: v7x
topology: tpu7x:2x2x1
jax: 0.10.0
libtpu: 0.0.40
codegen_flags: <defaults>
</compile_context>

<pallas_src>
import jax
import jax.numpy as jnp
from jax.experimental import pallas as pl
from jax.experimental.pallas import tpu as pltpu

NEG_SLOPE = 0.01  # nn.LeakyReLU default negative slope


def _leaky_relu(x):
    return jnp.where(x > 0, x, NEG_SLOPE * x)


def _round_up(x, m):
    return ((x + m - 1) // m) * m


def _pad_to(x, shape):
    pads = [(0, s - d) for d, s in zip(x.shape, shape)]
    return jnp.pad(x, pads)


# --------------------------------------------------------------------------
# Kernel: one graph per grid step, everything for that graph VMEM-resident.
# --------------------------------------------------------------------------
def afp_kernel(adj_ref, nf_ref, ef_ref,
               wn_ref, bn_ref, we_ref, be_ref,
               wmsg_ref, wemsg_ref, wself_ref, bupd_ref,
               watt_ref, batt_ref, wmol_ref, bmol_ref,
               wl1_ref, bl1_ref, wl2_ref, bl2_ref,
               pred_ref, attn_ref):
    f32, bf16 = jnp.float32, jnp.bfloat16
    L = wmsg_ref.shape[0]

    adj = adj_ref[...]                                             # [N, N] f32
    adj_b = adj.astype(bf16)

    # --- embedding_node_lin ------------------------------------------------
    node = (jnp.dot(nf_ref[...], wn_ref[...], preferred_element_type=f32)
            + bn_ref[...])                                         # [N, HP]

    # --- embedding_edge_lin + neighbour aggregation (reordered) -------------
    # sum_j adj[i,j]*(ef[i,j] @ We + be) == (sum_j adj[i,j]*ef[i,j]) @ We
    #                                       + (sum_j adj[i,j]) * be
    ef = ef_ref[...].astype(f32)                                   # [N, N, E]
    e_agg_raw = jnp.sum(adj[:, :, None] * ef, axis=1)              # [N, E]
    deg = jnp.sum(adj, axis=1, keepdims=True)                      # [N, 1]
    e_agg = (jnp.dot(e_agg_raw.astype(bf16), we_ref[...],
                     preferred_element_type=f32)
             + deg * be_ref[...])                                  # [N, HP]
    e_agg_b = e_agg.astype(bf16)

    # --- Atom_Attentive (MPNNs): L rounds of edge-conditioned msg passing ---
    # TODO(synk): fold into lax.fori_loop over the [L, HP, HP] stacks if
    # conv_layers grows large enough for the unrolled body to spill.
    h = node
    for l in range(L):
        hb = h.astype(bf16)
        inner = jnp.dot(hb, wmsg_ref[l], preferred_element_type=f32)
        msg = jnp.dot(adj_b, inner.astype(bf16), preferred_element_type=f32)
        msg = msg + jnp.dot(e_agg_b, wemsg_ref[l], preferred_element_type=f32)
        h = _leaky_relu(jnp.dot(hb, wself_ref[l], preferred_element_type=f32)
                        + msg + bupd_ref[l])                       # [N, HP]

    # --- Mol_Attentive: lane-axis softmax readout to a super node -----------
    logits = _leaky_relu(
        jnp.dot(watt_ref[...], h.T, preferred_element_type=f32)
        + batt_ref[...])                                           # [1, N]
    m = jnp.max(logits, axis=1, keepdims=True)
    e = jnp.exp(logits - m)
    denom = jnp.sum(e, axis=1, keepdims=True)
    alpha = e * pl.reciprocal(denom, approx=True)                  # [1, N]

    # (alpha @ h) @ W_mol  ==  alpha @ (h @ W_mol)  but much cheaper.
    pooled = jnp.dot(alpha, h, preferred_element_type=f32)         # [1, HP]
    super_node = jax.nn.relu(
        jnp.dot(pooled.astype(bf16), wmol_ref[...],
                preferred_element_type=f32) + bmol_ref[...])       # [1, HP]

    # --- Linears head: ReLU(Linear(H->H)) -> Linear(H->target) --------------
    x = jax.nn.relu(jnp.dot(super_node.astype(bf16), wl1_ref[...],
                            preferred_element_type=f32) + bl1_ref[...])
    pred = (jnp.dot(x.astype(bf16), wl2_ref[...],
                    preferred_element_type=f32) + bl2_ref[...])    # [1, TP]

    pred_ref[...] = pred
    attn_ref[...] = alpha


# --------------------------------------------------------------------------
# Wrapper: pads params to lane-aligned sizes, builds grid over graphs.
# --------------------------------------------------------------------------
def _pack_params(params, HP, TP):
    bf16, f32 = jnp.bfloat16, jnp.float32
    L = params["W_msg"].shape[0]
    dn = params["W_node"].shape[0]
    de = params["W_edge"].shape[0]
    return {
        "W_node": _pad_to(params["W_node"], (dn, HP)).astype(bf16),
        "b_node": _pad_to(params["b_node"], (1, HP)).astype(f32),
        "W_edge": _pad_to(params["W_edge"], (de, HP)).astype(bf16),
        "b_edge": _pad_to(params["b_edge"], (1, HP)).astype(f32),
        "W_msg":  _pad_to(params["W_msg"],  (L, HP, HP)).astype(bf16),
        "W_emsg": _pad_to(params["W_emsg"], (L, HP, HP)).astype(bf16),
        "W_self": _pad_to(params["W_self"], (L, HP, HP)).astype(bf16),
        "b_upd":  _pad_to(params["b_upd"],  (L, 1, HP)).astype(f32),
        # attention vector stored row-major [1, HP] so logits come out [1, N]
        "w_att": _pad_to(params["w_att"].T, (1, HP)).astype(f32),
        "b_att": params["b_att"].astype(f32),                      # [1, 1]
        "W_mol": _pad_to(params["W_mol"], (HP, HP)).astype(bf16),
        "b_mol": _pad_to(params["b_mol"], (1, HP)).astype(f32),
        "W_l1":  _pad_to(params["W_l1"], (HP, HP)).astype(bf16),
        "b_l1":  _pad_to(params["b_l1"], (1, HP)).astype(f32),
        "W_l2":  _pad_to(params["W_l2"], (HP, TP)).astype(bf16),
        "b_l2":  _pad_to(params["b_l2"], (1, TP)).astype(f32),
    }


def afp_forward(adj, node_feats, edge_feats, params):
    """Batched forward pass; one graph per grid step."""
    B, N, _ = adj.shape
    Dn = node_feats.shape[-1]
    E = edge_feats.shape[-1]
    H = params["W_node"].shape[1]
    T = params["W_l2"].shape[1]
    HP = _round_up(max(H, 1), 128)
    TP = _round_up(max(T, 1), 128)

    packed = _pack_params(params, HP, TP)
    w_order = ("W_node", "b_node", "W_edge", "b_edge",
               "W_msg", "W_emsg", "W_self", "b_upd",
               "w_att", "b_att", "W_mol", "b_mol",
               "W_l1", "b_l1", "W_l2", "b_l2")
    w_args = tuple(packed[k] for k in w_order)

    adj = adj.astype(jnp.float32)
    nf = node_feats.astype(jnp.bfloat16)    # matmul operand -> bf16
    ef = edge_feats.astype(jnp.bfloat16)    # halves HBM/VMEM traffic

    def _graph_spec(block_shape):
        nd = len(block_shape)
        return pl.BlockSpec((None,) + tuple(block_shape),
                            lambda b, _nd=nd: (b,) + (0,) * _nd)

    def _const_spec(arr):
        nd = arr.ndim
        return pl.BlockSpec(arr.shape, lambda b, _nd=nd: (0,) * _nd)

    in_specs = ([_graph_spec((N, N)),
                 _graph_spec((N, Dn)),
                 _graph_spec((N, N, E))]
                + [_const_spec(w) for w in w_args])

    out_specs = (pl.BlockSpec((None, 1, TP), lambda b: (b, 0, 0)),
                 pl.BlockSpec((None, 1, N), lambda b: (b, 0, 0)))
    out_shape = (jax.ShapeDtypeStruct((B, 1, TP), jnp.float32),
                 jax.ShapeDtypeStruct((B, 1, N), jnp.float32))

    # Rough per-step VMEM budget (weights + double-buffered per-graph blocks
    # + outputs + slack); never set below the 32 MiB scoped default.
    blk_in = ((adj.size // B) * adj.dtype.itemsize
              + (nf.size // B) * nf.dtype.itemsize
              + (ef.size // B) * ef.dtype.itemsize)
    w_bytes = sum(int(w.size) * w.dtype.itemsize for w in w_args)
    est = w_bytes + 2 * blk_in + 2 * (TP + N) * 4 + (8 << 20)
    vmem_limit = int(max(est, 32 << 20))

    pred_pad, attn_pad = pl.pallas_call(
        afp_kernel,
        grid=(B,),
        in_specs=in_specs,
        out_specs=out_specs,
        out_shape=out_shape,
        compiler_params=pltpu.CompilerParams(
            dimension_semantics=("parallel",),
            vmem_limit_bytes=vmem_limit),
    )(adj, nf, ef, *w_args)

    pred = pred_pad[:, 0, :T]       # [B, target_dim]
    attn = attn_pad[:, 0, :]        # [B, N] per-node attention weights
    return pred, attn


def init_params(key, node_dim, edge_dim, hidden_dim, conv_layers, target_dim):
    H, L = hidden_dim, conv_layers
    ks = jax.random.split(key, 3 * L + 6)

    def lin(k, fan_in, fan_out):
        return (jax.random.normal(k, (fan_in, fan_out), jnp.float32)
                / jnp.sqrt(float(fan_in)))

    params = {
        "W_node": lin(ks[0], node_dim, H), "b_node": jnp.zeros((1, H), jnp.float32),
        "W_edge": lin(ks[1], edge_dim, H), "b_edge": jnp.zeros((1, H), jnp.float32),
        # MPNN (Atom_Attentive) stacked per-layer weights
        "W_msg":  jnp.stack([lin(ks[2 + i], H, H) for i in range(L)]),
        "W_emsg": jnp.stack([lin(ks[2 + L + i], H, H) for i in range(L)]),
        "W_self": jnp.stack([lin(ks[2 + 2 * L + i], H, H) for i in range(L)]),
        "b_upd":  jnp.zeros((L, 1, H), jnp.float32),
        # Mol_Attentive readout
        "w_att": lin(ks[2 + 3 * L], H, 1), "b_att": jnp.zeros((1, 1), jnp.float32),
        "W_mol": lin(ks[3 + 3 * L], H, H), "b_mol": jnp.zeros((1, H), jnp.float32),
        # Linears head
        "W_l1": lin(ks[4 + 3 * L], H, H), "b_l1": jnp.zeros((1, H), jnp.float32),
        "W_l2": lin(ks[5 + 3 * L], H, target_dim),
        "b_l2": jnp.zeros((1, target_dim), jnp.float32),
    }
    return params


if __name__ == "__main__":
    key = jax.random.PRNGKey(0)
    k_adj, k_nf, k_ef, k_par = jax.random.split(key, 4)

    # small config consistent with the module defaults
    B = 4            # graphs per batched call (grid axis)
    N = 8            # nodes per graph
    node_dim = 16
    edge_dim = 8
    hidden_dim = 64
    conv_layers = 4
    target_dim = 2

    # deterministic dense symmetric graphs (no self loops) + features
    a = (jax.random.uniform(k_adj, (B, N, N)) < 0.4).astype(jnp.float32)
    eye = jnp.eye(N, dtype=jnp.float32)[None]
    adj = jnp.maximum(a, jnp.swapaxes(a, 1, 2)) * (1.0 - eye)
    node_feats = jax.random.normal(k_nf, (B, N, node_dim), jnp.float32)
    edge_feats = jax.random.normal(k_ef, (B, N, N, edge_dim), jnp.float32)

    params = init_params(k_par, node_dim, edge_dim, hidden_dim,
                         conv_layers, target_dim)

    pred, attn = afp_forward(adj, node_feats, edge_feats, params)
    jax.block_until_ready((pred, attn))

    assert pred.shape == (B, target_dim)
    assert attn.shape == (B, N)
    assert bool(jnp.all(jnp.isfinite(pred)))
    print("KERNEL_OK")
</pallas_src>

<mosaic_0001>
module attributes {stable_mosaic.version = 11 : i64} {
  func.func @afp_kernel(%arg0: i32, %arg1: memref<1x8x8xf32, #tpu.memory_space<vmem>>, %arg2: memref<1x8x16xbf16, #tpu.memory_space<vmem>>, %arg3: memref<1x8x8x8xbf16, #tpu.memory_space<vmem>>, %arg4: memref<16x128xbf16, #tpu.memory_space<vmem>>, %arg5: memref<1x128xf32, #tpu.memory_space<vmem>>, %arg6: memref<8x128xbf16, #tpu.memory_space<vmem>>, %arg7: memref<1x128xf32, #tpu.memory_space<vmem>>, %arg8: memref<4x128x128xbf16, #tpu.memory_space<vmem>>, %arg9: memref<4x128x128xbf16, #tpu.memory_space<vmem>>, %arg10: memref<4x128x128xbf16, #tpu.memory_space<vmem>>, %arg11: memref<4x1x128xf32, #tpu.memory_space<vmem>>, %arg12: memref<1x128xf32, #tpu.memory_space<vmem>>, %arg13: memref<1x1xf32, #tpu.memory_space<vmem>>, %arg14: memref<128x128xbf16, #tpu.memory_space<vmem>>, %arg15: memref<1x128xf32, #tpu.memory_space<vmem>>, %arg16: memref<128x128xbf16, #tpu.memory_space<vmem>>, %arg17: memref<1x128xf32, #tpu.memory_space<vmem>>, %arg18: memref<128x128xbf16, #tpu.memory_space<vmem>>, %arg19: memref<1x128xf32, #tpu.memory_space<vmem>>, %arg20: memref<1x1x128xf32, #tpu.memory_space<vmem>>, %arg21: memref<1x1x8xf32, #tpu.memory_space<vmem>>) attributes {dimension_semantics = [#tpu.dimension_semantics<parallel>], iteration_bounds = array<i64: 4>, scalar_prefetch = 0 : i64, scratch_operands = 0 : i64, tpu.core_type = #tpu.core_type<tc>, window_params = [{transform_indices = @transform_0, window_bounds = array<i64: 1, 8, 8>}, {transform_indices = @transform_1, window_bounds = array<i64: 1, 8, 16>}, {transform_indices = @transform_2, window_bounds = array<i64: 1, 8, 8, 8>}, {pipeline_mode = #tpu.pipeline_mode<synchronous>, transform_indices = @transform_3, window_bounds = array<i64: 16, 128>}, {pipeline_mode = #tpu.pipeline_mode<synchronous>, transform_indices = @transform_4, window_bounds = array<i64: 1, 128>}, {pipeline_mode = #tpu.pipeline_mode<synchronous>, transform_indices = @transform_5, window_bounds = array<i64: 8, 128>}, {pipeline_mode = #tpu.pipeline_mode<synchronous>, transform_indices = @transform_6, window_bounds = array<i64: 1, 128>}, {pipeline_mode = #tpu.pipeline_mode<synchronous>, transform_indices = @transform_7, window_bounds = array<i64: 4, 128, 128>}, {pipeline_mode = #tpu.pipeline_mode<synchronous>, transform_indices = @transform_8, window_bounds = array<i64: 4, 128, 128>}, {pipeline_mode = #tpu.pipeline_mode<synchronous>, transform_indices = @transform_9, window_bounds = array<i64: 4, 128, 128>}, {pipeline_mode = #tpu.pipeline_mode<synchronous>, transform_indices = @transform_10, window_bounds = array<i64: 4, 1, 128>}, {pipeline_mode = #tpu.pipeline_mode<synchronous>, transform_indices = @transform_11, window_bounds = array<i64: 1, 128>}, {pipeline_mode = #tpu.pipeline_mode<synchronous>, transform_indices = @transform_12, window_bounds = array<i64: 1, 1>}, {pipeline_mode = #tpu.pipeline_mode<synchronous>, transform_indices = @transform_13, window_bounds = array<i64: 128, 128>}, {pipeline_mode = #tpu.pipeline_mode<synchronous>, transform_indices = @transform_14, window_bounds = array<i64: 1, 128>}, {pipeline_mode = #tpu.pipeline_mode<synchronous>, transform_indices = @transform_15, window_bounds = array<i64: 128, 128>}, {pipeline_mode = #tpu.pipeline_mode<synchronous>, transform_indices = @transform_16, window_bounds = array<i64: 1, 128>}, {pipeline_mode = #tpu.pipeline_mode<synchronous>, transform_indices = @transform_17, window_bounds = array<i64: 128, 128>}, {pipeline_mode = #tpu.pipeline_mode<synchronous>, transform_indices = @transform_18, window_bounds = array<i64: 1, 128>}, {transform_indices = @transform_19, window_bounds = array<i64: 1, 1, 128>}, {transform_indices = @transform_20, window_bounds = array<i64: 1, 1, 8>}]} {
    %c0 = arith.constant 0 : index
    %c0_0 = arith.constant 0 : index
    %c0_1 = arith.constant 0 : index
    %0 = vector.load %arg1[%c0, %c0_0, %c0_1] : memref<1x8x8xf32, #tpu.memory_space<vmem>>, vector<1x8x8xf32>
    %1 = vector.shape_cast %0 : vector<1x8x8xf32> to vector<8x8xf32>
    %2 = arith.truncf %1 : vector<8x8xf32> to vector<8x8xbf16>
    %c0_2 = arith.constant 0 : index
    %c0_3 = arith.constant 0 : index
    %c0_4 = arith.constant 0 : index
    %3 = vector.load %arg2[%c0_2, %c0_3, %c0_4] : memref<1x8x16xbf16, #tpu.memory_space<vmem>>, vector<1x8x16xbf16>
    %4 = vector.shape_cast %3 : vector<1x8x16xbf16> to vector<8x16xbf16>
    %c0_5 = arith.constant 0 : index
    %c0_6 = arith.constant 0 : index
    %5 = vector.load %arg4[%c0_5, %c0_6] : memref<16x128xbf16, #tpu.memory_space<vmem>>, vector<16x128xbf16>
    %cst = arith.constant dense<0.000000e+00> : vector<8x128xf32>
    %6 = tpu.matmul %4, %5, %cst {dimension_numbers = #tpu.dot_dimension_numbers<[1], [0], [0], [1], [0, 0, 1, 1], [], []>} : vector<8x16xbf16>, vector<16x128xbf16>, vector<8x128xf32> -> vector<8x128xf32>
    %c0_7 = arith.constant 0 : index
    %c0_8 = arith.constant 0 : index
    %7 = vector.load %arg5[%c0_7, %c0_8] : memref<1x128xf32, #tpu.memory_space<vmem>>, vector<1x128xf32>
    %8 = vector.broadcast %7 : vector<1x128xf32> to vector<8x128xf32>
    %9 = arith.addf %6, %8 : vector<8x128xf32>
    %c0_9 = arith.constant 0 : index
    %c0_10 = arith.constant 0 : index
    %c0_11 = arith.constant 0 : index
    %c0_12 = arith.constant 0 : index
    %10 = vector.load %arg3[%c0_9, %c0_10, %c0_11, %c0_12] : memref<1x8x8x8xbf16, #tpu.memory_space<vmem>>, vector<1x8x8x8xbf16>
    %11 = vector.shape_cast %10 : vector<1x8x8x8xbf16> to vector<8x8x8xbf16>
    %12 = arith.extf %11 : vector<8x8x8xbf16> to vector<8x8x8xf32>
    %13 = vector.shape_cast %1 : vector<8x8xf32> to vector<8x8x1xf32>
    %14 = vector.broadcast %13 : vector<8x8x1xf32> to vector<8x8x8xf32>
    %15 = arith.mulf %14, %12 : vector<8x8x8xf32>
    %cst_13 = arith.constant dense<0.000000e+00> : vector<8x8xf32>
    %16 = vector.multi_reduction <add>, %15, %cst_13 [1] : vector<8x8x8xf32> to vector<8x8xf32>
    %cst_14 = arith.constant dense<0.000000e+00> : vector<8xf32>
    %17 = vector.multi_reduction <add>, %1, %cst_14 [1] : vector<8x8xf32> to vector<8xf32>
    %18 = vector.shape_cast %17 : vector<8xf32> to vector<8x1xf32>
    %19 = arith.truncf %16 : vector<8x8xf32> to vector<8x8xbf16>
    %c0_15 = arith.constant 0 : index
    %c0_16 = arith.constant 0 : index
    %20 = vector.load %arg6[%c0_15, %c0_16] : memref<8x128xbf16, #tpu.memory_space<vmem>>, vector<8x128xbf16>
    %cst_17 = arith.constant dense<0.000000e+00> : vector<8x128xf32>
    %21 = tpu.matmul %19, %20, %cst_17 {dimension_numbers = #tpu.dot_dimension_numbers<[1], [0], [0], [1], [0, 0, 1, 1], [], []>} : vector<8x8xbf16>, vector<8x128xbf16>, vector<8x128xf32> -> vector<8x128xf32>
    %c0_18 = arith.constant 0 : index
    %c0_19 = arith.constant 0 : index
    %22 = vector.load %arg7[%c0_18, %c0_19] : memref<1x128xf32, #tpu.memory_space<vmem>>, vector<1x128xf32>
    %23 = vector.broadcast %18 : vector<8x1xf32> to vector<8x128xf32>
    %24 = vector.broadcast %22 : vector<1x128xf32> to vector<8x128xf32>
    %25 = arith.mulf %23, %24 : vector<8x128xf32>
    %26 = arith.addf %21, %25 : vector<8x128xf32>
    %27 = arith.truncf %26 : vector<8x128xf32> to vector<8x128xbf16>
    %28 = arith.truncf %9 : vector<8x128xf32> to vector<8x128xbf16>
    %c0_20 = arith.constant 0 : index
    %c0_21 = arith.constant 0 : index
    %c0_22 = arith.constant 0 : index
    %29 = vector.load %arg8[%c0_20, %c0_21, %c0_22] : memref<4x128x128xbf16, #tpu.memory_space<vmem>>, vector<1x128x128xbf16>
    %30 = vector.shape_cast %29 : vector<1x128x128xbf16> to vector<128x128xbf16>
    %cst_23 = arith.constant dense<0.000000e+00> : vector<8x128xf32>
    %31 = tpu.matmul %28, %30, %cst_23 {dimension_numbers = #tpu.dot_dimension_numbers<[1], [0], [0], [1], [0, 0, 1, 1], [], []>} : vector<8x128xbf16>, vector<128x128xbf16>, vector<8x128xf32> -> vector<8x128xf32>
    %32 = arith.truncf %31 : vector<8x128xf32> to vector<8x128xbf16>
    %cst_24 = arith.constant dense<0.000000e+00> : vector<8x128xf32>
    %33 = tpu.matmul %2, %32, %cst_24 {dimension_numbers = #tpu.dot_dimension_numbers<[1], [0], [0], [1], [0, 0, 1, 1], [], []>} : vector<8x8xbf16>, vector<8x128xbf16>, vector<8x128xf32> -> vector<8x128xf32>
    %c0_25 = arith.constant 0 : index
    %c0_26 = arith.constant 0 : index
    %c0_27 = arith.constant 0 : index
    %34 = vector.load %arg9[%c0_25, %c0_26, %c0_27] : memref<4x128x128xbf16, #tpu.memory_space<vmem>>, vector<1x128x128xbf16>
    %35 = vector.shape_cast %34 : vector<1x128x128xbf16> to vector<128x128xbf16>
    %cst_28 = arith.constant dense<0.000000e+00> : vector<8x128xf32>
    %36 = tpu.matmul %27, %35, %cst_28 {dimension_numbers = #tpu.dot_dimension_numbers<[1], [0], [0], [1], [0, 0, 1, 1], [], []>} : vector<8x128xbf16>, vector<128x128xbf16>, vector<8x128xf32> -> vector<8x128xf32>
    %37 = arith.addf %33, %36 : vector<8x128xf32>
    %c0_29 = arith.constant 0 : index
    %c0_30 = arith.constant 0 : index
    %c0_31 = arith.constant 0 : index
    %38 = vector.load %arg10[%c0_29, %c0_30, %c0_31] : memref<4x128x128xbf16, #tpu.memory_space<vmem>>, vector<1x128x128xbf16>
    %39 = vector.shape_cast %38 : vector<1x128x128xbf16> to vector<128x128xbf16>
    %cst_32 = arith.constant dense<0.000000e+00> : vector<8x128xf32>
    %40 = tpu.matmul %28, %39, %cst_32 {dimension_numbers = #tpu.dot_dimension_numbers<[1], [0], [0], [1], [0, 0, 1, 1], [], []>} : vector<8x128xbf16>, vector<128x128xbf16>, vector<8x128xf32> -> vector<8x128xf32>
    %41 = arith.addf %40, %37 : vector<8x128xf32>
    %c0_33 = arith.constant 0 : index
    %c0_34 = arith.constant 0 : index
    %c0_35 = arith.constant 0 : index
    %42 = vector.load %arg11[%c0_33, %c0_34, %c0_35] : memref<4x1x128xf32, #tpu.memory_space<vmem>>, vector<1x1x128xf32>
    %43 = vector.shape_cast %42 : vector<1x1x128xf32> to vector<1x128xf32>
    %44 = vector.broadcast %43 : vector<1x128xf32> to vector<8x128xf32>
    %45 = arith.addf %41, %44 : vector<8x128xf32>
    %cst_36 = arith.constant 0.000000e+00 : f32
    %46 = vector.broadcast %cst_36 : f32 to vector<8x128xf32>
    %47 = arith.cmpf ogt, %45, %46 : vector<8x128xf32>
    %cst_37 = arith.constant 0.00999999977 : f32
    %48 = vector.broadcast %cst_37 : f32 to vector<8x128xf32>
    %49 = arith.mulf %48, %45 : vector<8x128xf32>
    %50 = arith.select %47, %45, %49 : vector<8x128xi1>, vector<8x128xf32>
    %51 = arith.truncf %50 : vector<8x128xf32> to vector<8x128xbf16>
    %c1 = arith.constant 1 : index
    %c0_38 = arith.constant 0 : index
    %c0_39 = arith.constant 0 : index
    %52 = vector.load %arg8[%c1, %c0_38, %c0_39] : memref<4x128x128xbf16, #tpu.memory_space<vmem>>, vector<1x128x128xbf16>
    %53 = vector.shape_cast %52 : vector<1x128x128xbf16> to vector<128x128xbf16>
    %cst_40 = arith.constant dense<0.000000e+00> : vector<8x128xf32>
    %54 = tpu.matmul %51, %53, %cst_40 {dimension_numbers = #tpu.dot_dimension_numbers<[1], [0], [0], [1], [0, 0, 1, 1], [], []>} : vector<8x128xbf16>, vector<128x128xbf16>, vector<8x128xf32> -> vector<8x128xf32>
    %55 = arith.truncf %54 : vector<8x128xf32> to vector<8x128xbf16>
    %cst_41 = arith.constant dense<0.000000e+00> : vector<8x128xf32>
    %56 = tpu.matmul %2, %55, %cst_41 {dimension_numbers = #tpu.dot_dimension_numbers<[1], [0], [0], [1], [0, 0, 1, 1], [], []>} : vector<8x8xbf16>, vector<8x128xbf16>, vector<8x128xf32> -> vector<8x128xf32>
    %c1_42 = arith.constant 1 : index
    %c0_43 = arith.constant 0 : index
    %c0_44 = arith.constant 0 : index
    %57 = vector.load %arg9[%c1_42, %c0_43, %c0_44] : memref<4x128x128xbf16, #tpu.memory_space<vmem>>, vector<1x128x128xbf16>
    %58 = vector.shape_cast %57 : vector<1x128x128xbf16> to vector<128x128xbf16>
    %cst_45 = arith.constant dense<0.000000e+00> : vector<8x128xf32>
    %59 = tpu.matmul %27, %58, %cst_45 {dimension_numbers = #tpu.dot_dimension_numbers<[1], [0], [0], [1], [0, 0, 1, 1], [], []>} : vector<8x128xbf16>, vector<128x128xbf16>, vector<8x128xf32> -> vector<8x128xf32>
    %60 = arith.addf %56, %59 : vector<8x128xf32>
    %c1_46 = arith.constant 1 : index
    %c0_47 = arith.constant 0 : index
    %c0_48 = arith.constant 0 : index
    %61 = vector.load %arg10[%c1_46, %c0_47, %c0_48] : memref<4x128x128xbf16, #tpu.memory_space<vmem>>, vector<1x128x128xbf16>
    %62 = vector.shape_cast %61 : vector<1x128x128xbf16> to vector<128x128xbf16>
    %cst_49 = arith.constant dense<0.000000e+00> : vector<8x128xf32>
    %63 = tpu.matmul %51, %62, %cst_49 {dimension_numbers = #tpu.dot_dimension_numbers<[1], [0], [0], [1], [0, 0, 1, 1], [], []>} : vector<8x128xbf16>, vector<128x128xbf16>, vector<8x128xf32> -> vector<8x128xf32>
    %64 = arith.addf %63, %60 : vector<8x128xf32>
    %c1_50 = arith.constant 1 : index
    %c0_51 = arith.constant 0 : index
    %c0_52 = arith.constant 0 : index
    %65 = vector.load %arg11[%c1_50, %c0_51, %c0_52] : memref<4x1x128xf32, #tpu.memory_space<vmem>>, vector<1x1x128xf32>
    %66 = vector.shape_cast %65 : vector<1x1x128xf32> to vector<1x128xf32>
    %67 = vector.broadcast %66 : vector<1x128xf32> to vector<8x128xf32>
    %68 = arith.addf %64, %67 : vector<8x128xf32>
    %cst_53 = arith.constant 0.000000e+00 : f32
    %69 = vector.broadcast %cst_53 : f32 to vector<8x128xf32>
    %70 = arith.cmpf ogt, %68, %69 : vector<8x128xf32>
    %cst_54 = arith.constant 0.00999999977 : f32
    %71 = vector.broadcast %cst_54 : f32 to vector<8x128xf32>
    %72 = arith.mulf %71, %68 : vector<8x128xf32>
    %73 = arith.select %70, %68, %72 : vector<8x128xi1>, vector<8x128xf32>
    %74 = arith.truncf %73 : vector<8x128xf32> to vector<8x128xbf16>
    %c2 = arith.constant 2 : index
    %c0_55 = arith.constant 0 : index
    %c0_56 = arith.constant 0 : index
    %75 = vector.load %arg8[%c2, %c0_55, %c0_56] : memref<4x128x128xbf16, #tpu.memory_space<vmem>>, vector<1x128x128xbf16>
    %76 = vector.shape_cast %75 : vector<1x128x128xbf16> to vector<128x128xbf16>
    %cst_57 = arith.constant dense<0.000000e+00> : vector<8x128xf32>
    %77 = tpu.matmul %74, %76, %cst_57 {dimension_numbers = #tpu.dot_dimension_numbers<[1], [0], [0], [1], [0, 0, 1, 1], [], []>} : vector<8x128xbf16>, vector<128x128xbf16>, vector<8x128xf32> -> vector<8x128xf32>
    %78 = arith.truncf %77 : vector<8x128xf32> to vector<8x128xbf16>
    %cst_58 = arith.constant dense<0.000000e+00> : vector<8x128xf32>
    %79 = tpu.matmul %2, %78, %cst_58 {dimension_numbers = #tpu.dot_dimension_numbers<[1], [0], [0], [1], [0, 0, 1, 1], [], []>} : vector<8x8xbf16>, vector<8x128xbf16>, vector<8x128xf32> -> vector<8x128xf32>
    %c2_59 = arith.constant 2 : index
    %c0_60 = arith.constant 0 : index
    %c0_61 = arith.constant 0 : index
    %80 = vector.load %arg9[%c2_59, %c0_60, %c0_61] : memref<4x128x128xbf16, #tpu.memory_space<vmem>>, vector<1x128x128xbf16>
    %81 = vector.shape_cast %80 : vector<1x128x128xbf16> to vector<128x128xbf16>
    %cst_62 = arith.constant dense<0.000000e+00> : vector<8x128xf32>
    %82 = tpu.matmul %27, %81, %cst_62 {dimension_numbers = #tpu.dot_dimension_numbers<[1], [0], [0], [1], [0, 0, 1, 1], [], []>} : vector<8x128xbf16>, vector<128x128xbf16>, vector<8x128xf32> -> vector<8x128xf32>
    %83 = arith.addf %79, %82 : vector<8x128xf32>
    %c2_63 = arith.constant 2 : index
    %c0_64 = arith.constant 0 : index
    %c0_65 = arith.constant 0 : index
    %84 = vector.load %arg10[%c2_63, %c0_64, %c0_65] : memref<4x128x128xbf16, #tpu.memory_space<vmem>>, vector<1x128x128xbf16>
    %85 = vector.shape_cast %84 : vector<1x128x128xbf16> to vector<128x128xbf16>
    %cst_66 = arith.constant dense<0.000000e+00> : vector<8x128xf32>
    %86 = tpu.matmul %74, %85, %cst_66 {dimension_numbers = #tpu.dot_dimension_numbers<[1], [0], [0], [1], [0, 0, 1, 1], [], []>} : vector<8x128xbf16>, vector<128x128xbf16>, vector<8x128xf32> -> vector<8x128xf32>
    %87 = arith.addf %86, %83 : vector<8x128xf32>
    %c2_67 = arith.constant 2 : index
    %c0_68 = arith.constant 0 : index
    %c0_69 = arith.constant 0 : index
    %88 = vector.load %arg11[%c2_67, %c0_68, %c0_69] : memref<4x1x128xf32, #tpu.memory_space<vmem>>, vector<1x1x128xf32>
    %89 = vector.shape_cast %88 : vector<1x1x128xf32> to vector<1x128xf32>
    %90 = vector.broadcast %89 : vector<1x128xf32> to vector<8x128xf32>
    %91 = arith.addf %87, %90 : vector<8x128xf32>
    %cst_70 = arith.constant 0.000000e+00 : f32
    %92 = vector.broadcast %cst_70 : f32 to vector<8x128xf32>
    %93 = arith.cmpf ogt, %91, %92 : vector<8x128xf32>
    %cst_71 = arith.constant 0.00999999977 : f32
    %94 = vector.broadcast %cst_71 : f32 to vector<8x128xf32>
    %95 = arith.mulf %94, %91 : vector<8x128xf32>
    %96 = arith.select %93, %91, %95 : vector<8x128xi1>, vector<8x128xf32>
    %97 = arith.truncf %96 : vector<8x128xf32> to vector<8x128xbf16>
    %c3 = arith.constant 3 : index
    %c0_72 = arith.constant 0 : index
    %c0_73 = arith.constant 0 : index
    %98 = vector.load %arg8[%c3, %c0_72, %c0_73] : memref<4x128x128xbf16, #tpu.memory_space<vmem>>, vector<1x128x128xbf16>
    %99 = vector.shape_cast %98 : vector<1x128x128xbf16> to vector<128x128xbf16>
    %cst_74 = arith.constant dense<0.000000e+00> : vector<8x128xf32>
    %100 = tpu.matmul %97, %99, %cst_74 {dimension_numbers = #tpu.dot_dimension_numbers<[1], [0], [0], [1], [0, 0, 1, 1], [], []>} : vector<8x128xbf16>, vector<128x128xbf16>, vector<8x128xf32> -> vector<8x128xf32>
    %101 = arith.truncf %100 : vector<8x128xf32> to vector<8x128xbf16>
    %cst_75 = arith.constant dense<0.000000e+00> : vector<8x128xf32>
    %102 = tpu.matmul %2, %101, %cst_75 {dimension_numbers = #tpu.dot_dimension_numbers<[1], [0], [0], [1], [0, 0, 1, 1], [], []>} : vector<8x8xbf16>, vector<8x128xbf16>, vector<8x128xf32> -> vector<8x128xf32>
    %c3_76 = arith.constant 3 : index
    %c0_77 = arith.constant 0 : index
    %c0_78 = arith.constant 0 : index
    %103 = vector.load %arg9[%c3_76, %c0_77, %c0_78] : memref<4x128x128xbf16, #tpu.memory_space<vmem>>, vector<1x128x128xbf16>
    %104 = vector.shape_cast %103 : vector<1x128x128xbf16> to vector<128x128xbf16>
    %cst_79 = arith.constant dense<0.000000e+00> : vector<8x128xf32>
    %105 = tpu.matmul %27, %104, %cst_79 {dimension_numbers = #tpu.dot_dimension_numbers<[1], [0], [0], [1], [0, 0, 1, 1], [], []>} : vector<8x128xbf16>, vector<128x128xbf16>, vector<8x128xf32> -> vector<8x128xf32>
    %106 = arith.addf %102, %105 : vector<8x128xf32>
    %c3_80 = arith.constant 3 : index
    %c0_81 = arith.constant 0 : index
    %c0_82 = arith.constant 0 : index
    %107 = vector.load %arg10[%c3_80, %c0_81, %c0_82] : memref<4x128x128xbf16, #tpu.memory_space<vmem>>, vector<1x128x128xbf16>
    %108 = vector.shape_cast %107 : vector<1x128x128xbf16> to vector<128x128xbf16>
    %cst_83 = arith.constant dense<0.000000e+00> : vector<8x128xf32>
    %109 = tpu.matmul %97, %108, %cst_83 {dimension_numbers = #tpu.dot_dimension_numbers<[1], [0], [0], [1], [0, 0, 1, 1], [], []>} : vector<8x128xbf16>, vector<128x128xbf16>, vector<8x128xf32> -> vector<8x128xf32>
    %110 = arith.addf %109, %106 : vector<8x128xf32>
    %c3_84 = arith.constant 3 : index
    %c0_85 = arith.constant 0 : index
    %c0_86 = arith.constant 0 : index
    %111 = vector.load %arg11[%c3_84, %c0_85, %c0_86] : memref<4x1x128xf32, #tpu.memory_space<vmem>>, vector<1x1x128xf32>
    %112 = vector.shape_cast %111 : vector<1x1x128xf32> to vector<1x128xf32>
    %113 = vector.broadcast %112 : vector<1x128xf32> to vector<8x128xf32>
    %114 = arith.addf %110, %113 : vector<8x128xf32>
    %cst_87 = arith.constant 0.000000e+00 : f32
    %115 = vector.broadcast %cst_87 : f32 to vector<8x128xf32>
    %116 = arith.cmpf ogt, %114, %115 : vector<8x128xf32>
    %cst_88 = arith.constant 0.00999999977 : f32
    %117 = vector.broadcast %cst_88 : f32 to vector<8x128xf32>
    %118 = arith.mulf %117, %114 : vector<8x128xf32>
    %119 = arith.select %116, %114, %118 : vector<8x128xi1>, vector<8x128xf32>
    %c0_89 = arith.constant 0 : index
    %c0_90 = arith.constant 0 : index
    %120 = vector.load %arg12[%c0_89, %c0_90] : memref<1x128xf32, #tpu.memory_space<vmem>>, vector<1x128xf32>
    %121 = tpu.transpose %119, [1, 0] : vector<8x128xf32> -> vector<128x8xf32>
    %cst_91 = arith.constant dense<0.000000e+00> : vector<1x8xf32>
    %122 = tpu.matmul %120, %121, %cst_91 {dimension_numbers = #tpu.dot_dimension_numbers<[1], [0], [0], [1], [0, 0, 1, 1], [], []>} : vector<1x128xf32>, vector<128x8xf32>, vector<1x8xf32> -> vector<1x8xf32>
    %c0_92 = arith.constant 0 : index
    %c0_93 = arith.constant 0 : index
    %123 = vector.load %arg13[%c0_92, %c0_93] : memref<1x1xf32, #tpu.memory_space<vmem>>, vector<1x1xf32>
    %124 = vector.broadcast %123 : vector<1x1xf32> to vector<1x8xf32>
    %125 = arith.addf %122, %124 : vector<1x8xf32>
    %cst_94 = arith.constant 0.000000e+00 : f32
    %126 = vector.broadcast %cst_94 : f32 to vector<1x8xf32>
    %127 = arith.cmpf ogt, %125, %126 : vector<1x8xf32>
    %cst_95 = arith.constant 0.00999999977 : f32
    %128 = vector.broadcast %cst_95 : f32 to vector<1x8xf32>
    %129 = arith.mulf %128, %125 : vector<1x8xf32>
    %130 = arith.select %127, %125, %129 : vector<1x8xi1>, vector<1x8xf32>
    %cst_96 = arith.constant dense<0xFF800000> : vector<1xf32>
    %131 = vector.multi_reduction <maximumf>, %130, %cst_96 [1] : vector<1x8xf32> to vector<1xf32>
    %132 = vector.shape_cast %131 : vector<1xf32> to vector<1x1xf32>
    %133 = vector.broadcast %132 : vector<1x1xf32> to vector<1x8xf32>
    %134 = arith.subf %130, %133 : vector<1x8xf32>
    %135 = math.exp %134 : vector<1x8xf32>
    %cst_97 = arith.constant dense<0.000000e+00> : vector<1xf32>
    %136 = vector.multi_reduction <add>, %135, %cst_97 [1] : vector<1x8xf32> to vector<1xf32>
    %137 = vector.shape_cast %136 : vector<1xf32> to vector<1x1xf32>
    %138 = tpu.reciprocal %137 {approx = true} : vector<1x1xf32> -> vector<1x1xf32>
    %139 = vector.broadcast %138 : vector<1x1xf32> to vector<1x8xf32>
    %140 = arith.mulf %135, %139 : vector<1x8xf32>
    %cst_98 = arith.constant dense<0.000000e+00> : vector<1x128xf32>
    %141 = tpu.matmul %140, %119, %cst_98 {dimension_numbers = #tpu.dot_dimension_numbers<[1], [0], [0], [1], [0, 0, 1, 1], [], []>} : vector<1x8xf32>, vector<8x128xf32>, vector<1x128xf32> -> vector<1x128xf32>
    %142 = arith.truncf %141 : vector<1x128xf32> to vector<1x128xbf16>
    %c0_99 = arith.constant 0 : index
    %c0_100 = arith.constant 0 : index
    %143 = vector.load %arg14[%c0_99, %c0_100] : memref<128x128xbf16, #tpu.memory_space<vmem>>, vector<128x128xbf16>
    %cst_101 = arith.constant dense<0.000000e+00> : vector<1x128xf32>
    %144 = tpu.matmul %142, %143, %cst_101 {dimension_numbers = #tpu.dot_dimension_numbers<[1], [0], [0], [1], [0, 0, 1, 1], [], []>} : vector<1x128xbf16>, vector<128x128xbf16>, vector<1x128xf32> -> vector<1x128xf32>
    %c0_102 = arith.constant 0 : index
    %c0_103 = arith.constant 0 : index
    %145 = vector.load %arg15[%c0_102, %c0_103] : memref<1x128xf32, #tpu.memory_space<vmem>>, vector<1x128xf32>
    %146 = arith.addf %144, %145 : vector<1x128xf32>
    %cst_104 = arith.constant 0.000000e+00 : f32
    %147 = vector.broadcast %cst_104 : f32 to vector<1x128xf32>
    %148 = arith.maximumf %146, %147 : vector<1x128xf32>
    %149 = arith.truncf %148 : vector<1x128xf32> to vector<1x128xbf16>
    %c0_105 = arith.constant 0 : index
    %c0_106 = arith.constant 0 : index
    %150 = vector.load %arg16[%c0_105, %c0_106] : memref<128x128xbf16, #tpu.memory_space<vmem>>, vector<128x128xbf16>
    %cst_107 = arith.constant dense<0.000000e+00> : vector<1x128xf32>
    %151 = tpu.matmul %149, %150, %cst_107 {dimension_numbers = #tpu.dot_dimension_numbers<[1], [0], [0], [1], [0, 0, 1, 1], [], []>} : vector<1x128xbf16>, vector<128x128xbf16>, vector<1x128xf32> -> vector<1x128xf32>
    %c0_108 = arith.constant 0 : index
    %c0_109 = arith.constant 0 : index
    %152 = vector.load %arg17[%c0_108, %c0_109] : memref<1x128xf32, #tpu.memory_space<vmem>>, vector<1x128xf32>
    %153 = arith.addf %151, %152 : vector<1x128xf32>
    %cst_110 = arith.constant 0.000000e+00 : f32
    %154 = vector.broadcast %cst_110 : f32 to vector<1x128xf32>
    %155 = arith.maximumf %153, %154 : vector<1x128xf32>
    %156 = arith.truncf %155 : vector<1x128xf32> to vector<1x128xbf16>
    %c0_111 = arith.constant 0 : index
    %c0_112 = arith.constant 0 : index
    %157 = vector.load %arg18[%c0_111, %c0_112] : memref<128x128xbf16, #tpu.memory_space<vmem>>, vector<128x128xbf16>
    %cst_113 = arith.constant dense<0.000000e+00> : vector<1x128xf32>
    %158 = tpu.matmul %156, %157, %cst_113 {dimension_numbers = #tpu.dot_dimension_numbers<[1], [0], [0], [1], [0, 0, 1, 1], [], []>} : vector<1x128xbf16>, vector<128x128xbf16>, vector<1x128xf32> -> vector<1x128xf32>
    %c0_114 = arith.constant 0 : index
    %c0_115 = arith.constant 0 : index
    %159 = vector.load %arg19[%c0_114, %c0_115] : memref<1x128xf32, #tpu.memory_space<vmem>>, vector<1x128xf32>
    %160 = arith.addf %158, %159 : vector<1x128xf32>
    %c0_116 = arith.constant 0 : index
    %c0_117 = arith.constant 0 : index
    %c0_118 = arith.constant 0 : index
    %161 = vector.load %arg20[%c0_116, %c0_117, %c0_118] : memref<1x1x128xf32, #tpu.memory_space<vmem>>, vector<1x1x128xf32>
    %162 = vector.shape_cast %161 : vector<1x1x128xf32> to vector<1x128xf32>
    %163 = vector.shape_cast %160 : vector<1x128xf32> to vector<1x1x128xf32>
    tpu.vector_store %arg20[%c0_116, %c0_117, %c0_118], %163 {strides = array<i32>} : memref<1x1x128xf32, #tpu.memory_space<vmem>>, vector<1x1x128xf32>,
    %c0_119 = arith.constant 0 : index
    %c0_120 = arith.constant 0 : index
    %c0_121 = arith.constant 0 : index
    %164 = vector.load %arg21[%c0_119, %c0_120, %c0_121] : memref<1x1x8xf32, #tpu.memory_space<vmem>>, vector<1x1x8xf32>
    %165 = vector.shape_cast %164 : vector<1x1x8xf32> to vector<1x8xf32>
    %166 = vector.shape_cast %140 : vector<1x8xf32> to vector<1x1x8xf32>
    tpu.vector_store %arg21[%c0_119, %c0_120, %c0_121], %166 {strides = array<i32>} : memref<1x1x8xf32, #tpu.memory_space<vmem>>, vector<1x1x8xf32>,
    return
  }
  func.func @transform_0(%arg0: i32) -> (i32, i32, i32) {
    %c0_i32 = arith.constant 0 : i32
    %c0_i32_0 = arith.constant 0 : i32
    %c0_i32_1 = arith.constant 0 : i32
    return %arg0, %c0_i32, %c0_i32_0 : i32, i32, i32
  }
  func.func @transform_1(%arg0: i32) -> (i32, i32, i32) {
    %c0_i32 = arith.constant 0 : i32
    %c0_i32_0 = arith.constant 0 : i32
    %c0_i32_1 = arith.constant 0 : i32
    return %arg0, %c0_i32, %c0_i32_0 : i32, i32, i32
  }
  func.func @transform_2(%arg0: i32) -> (i32, i32, i32, i32) {
    %c0_i32 = arith.constant 0 : i32
    %c0_i32_0 = arith.constant 0 : i32
    %c0_i32_1 = arith.constant 0 : i32
    %c0_i32_2 = arith.constant 0 : i32
    return %arg0, %c0_i32, %c0_i32_0, %c0_i32_1 : i32, i32, i32, i32
  }
  func.func @transform_3(%arg0: i32) -> (i32, i32) {
    %c0_i32 = arith.constant 0 : i32
    %c0_i32_0 = arith.constant 0 : i32
    %c0_i32_1 = arith.constant 0 : i32
    return %c0_i32, %c0_i32_0 : i32, i32
  }
  func.func @transform_4(%arg0: i32) -> (i32, i32) {
    %c0_i32 = arith.constant 0 : i32
    %c0_i32_0 = arith.constant 0 : i32
    %c0_i32_1 = arith.constant 0 : i32
    return %c0_i32, %c0_i32_0 : i32, i32
  }
  func.func @transform_5(%arg0: i32) -> (i32, i32) {
    %c0_i32 = arith.constant 0 : i32
    %c0_i32_0 = arith.constant 0 : i32
    %c0_i32_1 = arith.constant 0 : i32
    return %c0_i32, %c0_i32_0 : i32, i32
  }
  func.func @transform_6(%arg0: i32) -> (i32, i32) {
    %c0_i32 = arith.constant 0 : i32
    %c0_i32_0 = arith.constant 0 : i32
    %c0_i32_1 = arith.constant 0 : i32
    return %c0_i32, %c0_i32_0 : i32, i32
  }
  func.func @transform_7(%arg0: i32) -> (i32, i32, i32) {
    %c0_i32 = arith.constant 0 : i32
    %c0_i32_0 = arith.constant 0 : i32
    %c0_i32_1 = arith.constant 0 : i32
    %c0_i32_2 = arith.constant 0 : i32
    return %c0_i32, %c0_i32_0, %c0_i32_1 : i32, i32, i32
  }
  func.func @transform_8(%arg0: i32) -> (i32, i32, i32) {
    %c0_i32 = arith.constant 0 : i32
    %c0_i32_0 = arith.constant 0 : i32
    %c0_i32_1 = arith.constant 0 : i32
    %c0_i32_2 = arith.constant 0 : i32
    return %c0_i32, %c0_i32_0, %c0_i32_1 : i32, i32, i32
  }
  func.func @transform_9(%arg0: i32) -> (i32, i32, i32) {
    %c0_i32 = arith.constant 0 : i32
    %c0_i32_0 = arith.constant 0 : i32
    %c0_i32_1 = arith.constant 0 : i32
    %c0_i32_2 = arith.constant 0 : i32
    return %c0_i32, %c0_i32_0, %c0_i32_1 : i32, i32, i32
  }
  func.func @transform_10(%arg0: i32) -> (i32, i32, i32) {
    %c0_i32 = arith.constant 0 : i32
    %c0_i32_0 = arith.constant 0 : i32
    %c0_i32_1 = arith.constant 0 : i32
    %c0_i32_2 = arith.constant 0 : i32
    return %c0_i32, %c0_i32_0, %c0_i32_1 : i32, i32, i32
  }
  func.func @transform_11(%arg0: i32) -> (i32, i32) {
    %c0_i32 = arith.constant 0 : i32
    %c0_i32_0 = arith.constant 0 : i32
    %c0_i32_1 = arith.constant 0 : i32
    return %c0_i32, %c0_i32_0 : i32, i32
  }
  func.func @transform_12(%arg0: i32) -> (i32, i32) {
    %c0_i32 = arith.constant 0 : i32
    %c0_i32_0 = arith.constant 0 : i32
    %c0_i32_1 = arith.constant 0 : i32
    return %c0_i32, %c0_i32_0 : i32, i32
  }
  func.func @transform_13(%arg0: i32) -> (i32, i32) {
    %c0_i32 = arith.constant 0 : i32
    %c0_i32_0 = arith.constant 0 : i32
    %c0_i32_1 = arith.constant 0 : i32
    return %c0_i32, %c0_i32_0 : i32, i32
  }
  func.func @transform_14(%arg0: i32) -> (i32, i32) {
    %c0_i32 = arith.constant 0 : i32
    %c0_i32_0 = arith.constant 0 : i32
    %c0_i32_1 = arith.constant 0 : i32
    return %c0_i32, %c0_i32_0 : i32, i32
  }
  func.func @transform_15(%arg0: i32) -> (i32, i32) {
    %c0_i32 = arith.constant 0 : i32
    %c0_i32_0 = arith.constant 0 : i32
    %c0_i32_1 = arith.constant 0 : i32
    return %c0_i32, %c0_i32_0 : i32, i32
  }
  func.func @transform_16(%arg0: i32) -> (i32, i32) {
    %c0_i32 = arith.constant 0 : i32
    %c0_i32_0 = arith.constant 0 : i32
    %c0_i32_1 = arith.constant 0 : i32
    return %c0_i32, %c0_i32_0 : i32, i32
  }
  func.func @transform_17(%arg0: i32) -> (i32, i32) {
    %c0_i32 = arith.constant 0 : i32
    %c0_i32_0 = arith.constant 0 : i32
    %c0_i32_1 = arith.constant 0 : i32
    return %c0_i32, %c0_i32_0 : i32, i32
  }
  func.func @transform_18(%arg0: i32) -> (i32, i32) {
    %c0_i32 = arith.constant 0 : i32
    %c0_i32_0 = arith.constant 0 : i32
    %c0_i32_1 = arith.constant 0 : i32
    return %c0_i32, %c0_i32_0 : i32, i32
  }
  func.func @transform_19(%arg0: i32) -> (i32, i32, i32) {
    %c0_i32 = arith.constant 0 : i32
    %c0_i32_0 = arith.constant 0 : i32
    %c0_i32_1 = arith.constant 0 : i32
    return %arg0, %c0_i32, %c0_i32_0 : i32, i32, i32
  }
  func.func @transform_20(%arg0: i32) -> (i32, i32, i32) {
    %c0_i32 = arith.constant 0 : i32
    %c0_i32_0 = arith.constant 0 : i32
    %c0_i32_1 = arith.constant 0 : i32
    return %arg0, %c0_i32, %c0_i32_0 : i32, i32, i32
  }
}

</mosaic_0001>

<bundles_post_ra>
// kernel: tpu_custom_call.1
= control target key start
LH: loop header
LB: loop body
LE: loop exit
PB: predicated region body
PF: predicated region fallthrough
CT: control target
= control target key end

     0   :  { %s6071_s0 = inlined_call_operand.hbm [shape: f32[4,8,8], index: 0, kind: input, shape index: {}]   ;;  %s6072_s1 = inlined_call_operand.hbm [shape: bf16[4,8,16], index: 1, kind: input, shape index: {}]   ;;  %s6073_s2 = inlined_call_operand.hbm [shape: bf16[4,8,8,8], index: 2, kind: input, shape index: {}]   ;;  %s6074_s3 = inlined_call_operand.hbm [shape: bf16[16,128], index: 3, kind: input, shape index: {}]   ;;  %s6075_s4 = inlined_call_operand.hbm [shape: f32[1,128], index: 4, kind: input, shape index: {}]   ;;  %s6076_s5 = inlined_call_operand.hbm [shape: bf16[8,128], index: 5, kind: input, shape index: {}]   ;;  %s6077_s6 = inlined_call_operand.hbm [shape: f32[1,128], index: 6, kind: input, shape index: {}]   ;;  %s6078_s7 = inlined_call_operand.hbm [shape: bf16[4,128,128], index: 7, kind: input, shape index: {}]   ;;  %s6079_s8 = inlined_call_operand.hbm [shape: bf16[4,128,128], index: 8, kind: input, shape index: {}]   ;;  %s6080_s9 = inlined_call_operand.hbm [shape: bf16[4,128,128], index: 9, kind: input, shape index: {}]   ;;  %s6081_s10 = inlined_call_operand.hbm [shape: f32[4,1,128], index: 10, kind: input, shape index: {}]   ;;  %s6082_s11 = inlined_call_operand.hbm [shape: f32[1,128], index: 11, kind: input, shape index: {}]   ;;  %s6083_s12 = inlined_call_operand.<no memory space> [shape: f32[1,1], index: 12, kind: input, shape index: {}]   ;;  %s6084_s13 = inlined_call_operand.hbm [shape: bf16[128,128], index: 13, kind: input, shape index: {}]   ;;  %s6085_s14 = inlined_call_operand.hbm [shape: f32[1,128], index: 14, kind: input, shape index: {}]   ;;  %s6086_s15 = inlined_call_operand.hbm [shape: bf16[128,128], index: 15, kind: input, shape index: {}]   ;;  %s6087_s16 = inlined_call_operand.hbm [shape: f32[1,128], index: 16, kind: input, shape index: {}]   ;;  %s6088_s17 = inlined_call_operand.vmem [shape: bf16[128,128], index: 17, kind: input, shape index: {}]   ;;  %s6089_s18 = inlined_call_operand.vmem [shape: f32[1,128], index: 18, kind: input, shape index: {}]   ;;  %s6090_s19 = inlined_call_operand.hbm [shape: f32[4,1,128], index: 19, kind: output, shape index: {0}]   ;;  %s6091_s20 = inlined_call_operand.hbm [shape: f32[4,1,8], index: 20, kind: output, shape index: {1}]  }
   0x1   :  { %6127 = sst [smem:[#allocation49_spill]] %s6071_s0  ;;  %v26_v0 = vstv %s6083_s12 }
   0x2   :  { %6128 = sst [smem:[#allocation50_spill]] %s6072_s1  ;;  %27 = vst [vmem:[#allocation2] sm:$0x1] %v26_v0 }
   0x3   :  { %6129 = sst [smem:[#allocation51_spill]] %s6073_s2 }
   0x4   :  { %6130 = sst [smem:[#allocation52_spill]] %s6074_s3 }
   0x5   :  { %6131 = sst [smem:[#allocation53_spill]] %s6075_s4 }
   0x6   :  { %6132 = sst [smem:[#allocation54_spill]] %s6076_s5 }
   0x7   :  { %6133 = sst [smem:[#allocation55_spill]] %s6077_s6 }
   0x8   :  { %6134 = sst [smem:[#allocation56_spill]] %s6078_s7 }
   0x9   :  { %6135 = sst [smem:[#allocation57_spill]] %s6079_s8 }
   0xa   :  { %6136 = sst [smem:[#allocation58_spill]] %s6080_s9 }
   0xb   :  { %6137 = sst [smem:[#allocation59_spill]] %s6082_s11 }
   0xc   :  { %6138 = sst [smem:[#allocation60_spill]] %s6085_s14 }
   0xd   :  { %6139 = sst [smem:[#allocation61_spill]] %s6086_s15 }
   0xe   :  { %6140 = sst [smem:[#allocation62_spill]] %s6087_s16 }
   0xf   :  { %6141 = sst [smem:[#allocation63_spill]] %s6088_s17 }
  0x10   :  { %6142 = sst [smem:[#allocation64_spill]] %s6089_s18 }
  0x11   :  { %6143 = sst [smem:[#allocation65_spill]] %s6090_s19 }
  0x12   :  { %6144 = sst [smem:[#allocation66_spill]] %s6091_s20 }
  0x13   :  { %28 = vsyncpa [#allocation4], 0 }
  0x14   :  { %30 = vsyncpa [#allocation4 + $0x1], 0 }
  0x15   :  { %31 = vsyncpa [#allocation7], 0 }
  0x16   :  { %33 = vsyncpa [#allocation7 + $0x1], 0 }
  0x17   :  { %34 = vsyncpa [#allocation10], 0 }
  0x18   :  { %35 = vsyncpa [#allocation13], 0 }
  0x19   :  { %36 = vsyncpa [#allocation16], 0 }
  0x1a   :  { %37 = vsyncpa [#allocation19], 0 }
  0x1b   :  { %38 = vsyncpa [#allocation22], 0 }
  0x1c   :  { %39 = vsyncpa [#allocation25], 0 }
  0x1d   :  { %40 = vsyncpa [#allocation28], 0 }
  0x1e   :  { %41 = vsyncpa [#allocation5], 0 }
  0x1f   :  { %43 = vsyncpa [#allocation5 + $0x1], 0 }
  0x20   :  { %44 = vsyncpa [#allocation31], 0 }
  0x21   :  { %46 = vsyncpa [#allocation31 + $0x1], 0  ;;  %s5216_s23 = smov 0   ;;  %s5218_s24 = smov 0  }
  0x22   :  { %s5220_s12 = smov 0   ;;  %s5222_s2 = smov 0  }
  0x23 LB: > { %6145 = sst [smem:[#allocation43_spill]] %s5069_s23  ;;  %s5083_s25 = smov [#allocation9]   ;;  %s5081_s2 = sphi %s5222_s2, %s6207_s2   ;;  %s5077_s12 = sphi %s5220_s12, %s6209_s12   ;;  %s5073_s24 = sphi %s5218_s24, %s6211_s24   ;;  %s5069_s23 = sphi %s5216_s23, %s6210_s23  }
  0x24   : > { %6146 = sst [smem:[#allocation44_spill]] %s5077_s12  ;;  %s535_s3 = sshll.u32 %s5083_s25, 4  ;;  %s5242_s3 = int_to_ptr.vmem [resolvable:$true] %s535_s3 }
  0x25   : > { %s5237_s26 = sadd.s32 4294967295, %s5081_s2   ;;  %p3476_p0 = scmp.ge.s32.totalorder %s5081_s2, 1 }
  0x26   : > { %p6103_p1 = scmp.eq.s32.totalorder %s5237_s26, 0  ;;  %p523_p2 = scmp.lt.s32.totalorder %s5081_s2, 5 }
  0x27   : > { %s5084_s28 = smov [#allocation12]   ;;  %s5085_s30 = smov [#allocation15]  }
  0x28   : > { %p5244_p3 = pnand %p3476_p0, %p523_p2  ;;  %s560_s4 = sshll.u32 %s5084_s28, 4  ;;  %s5256_s4 = int_to_ptr.vmem [resolvable:$true] %s560_s4 }
  0x29   : > { %s581_s0 = sshll.u32 %s5085_s30, 4  ;;  %s6150_s22 = sld [smem:[#allocation52_spill]]  ;;  %s5258_s0 = int_to_ptr.vmem [resolvable:$true] %s581_s0 }
  0x2a   : > { %s6147_s27 = scalar_select %p5244_p3, 1, 0 }
  0x2b   : > { %p4232_p4 = pneg %p5244_p3 }
  0x2c   : > { %6148 = sst [smem:[#allocation45_spill]] %s6147_s27 }
  0x2d   : > { %p5252_p5 = pnand %p4232_p4, %p6103_p1 }
  0x2f   : > { %s6149_s29 = scalar_select %p5252_p5, 1, 0 }
  0x30   : > { %s4497_s25 = scalar_lea.hbm %s6150_s22, 128  ;;  %p5268_p7 = pneg %p5252_p5 }
  0x31   : > { %p4498_p6 = scmp.ne.s32.totalorder %s6150_s22, %s4497_s25  ;;  %p4504_p10 = scmp.lt.u32.totalorder %s4497_s25, %s6150_s22 }
  0x32   : > { %s6151_s28 = scalar_select %p5268_p7, 1, 0 }
  0x33   : > { %p4500_p8 = pnand %p5268_p7, %p4498_p6 }
  0x35   : > { %p4501_p9 = pneg %p4500_p8 }
  0x37   : > { %p4506_p11 = pnand %p4504_p10, %p4501_p9 }
  0x39   : > { %4509 = shalt.err (!%p4506_p11)
}
  0x3a   : > { %s4510_s18 = scalar_lea.vmem %s5242_s3, 128  ;;  %p4518_p2 = scmp.lt.s32.totalorder %s5242_s3, %s5242_s3 }
  0x3b   : > { %p4511_p12 = scmp.ne.s32.totalorder %s5242_s3, %s4510_s18  ;;  %p4519_p4 = scmp.lt.s32.totalorder %s4510_s18, %s4510_s18 }
  0x3d   : > { %p4513_p13 = pnand %p4511_p12, %p5268_p7  ;;  %p4520_p6 = por %p4519_p4, %p4518_p2 }
  0x3f   : > { %p4514_p0 = pneg %p4513_p13 }
  0x41   : > { %p4521_p8 = pnand %p4520_p6, %p4514_p0 }
  0x43   : > { %4524 = shalt.err (!%p4521_p8)
}
  0x44   : > { %s6105_s19 = smov 64   ;;  %s6107_s20 = smov 4  }
  0x45   : > { %4235 = dma.hbm_to_vmem [thread:$0]  (!%p5252_p5), %s6150_s22, 128, %s5242_s3, [#allocation10], %s6105_s19, %s6105_s19, %s6107_s20  }
  0x46   : > { %s6152_s5 = sld [smem:[#allocation54_spill]] }
  0x4c   : > { %s4525_s18 = scalar_lea.hbm %s6152_s5, 64 }
  0x4d   : > { %p4526_p9 = scmp.ne.s32.totalorder %s6152_s5, %s4525_s18  ;;  %p4532_p12 = scmp.lt.u32.totalorder %s4525_s18, %s6152_s5 }
  0x4f   : > { %p4528_p10 = pnand %p4526_p9, %p5268_p7 }
  0x51   : > { %p4529_p11 = pneg %p4528_p10 }
  0x53   : > { %p4534_p13 = pnand %p4532_p12, %p4529_p11 }
  0x55   : > { %4537 = shalt.err (!%p4534_p13)
}
  0x56   : > { %s4538_s3 = scalar_lea.vmem %s5256_s4, 64  ;;  %p4546_p6 = scmp.lt.s32.totalorder %s5256_s4, %s5256_s4 }
  0x57   : > { %p4539_p0 = scmp.ne.s32.totalorder %s5256_s4, %s4538_s3  ;;  %p4547_p8 = scmp.lt.s32.totalorder %s4538_s3, %s4538_s3 }
  0x59   : > { %p4541_p2 = pnand %p4539_p0, %p5268_p7  ;;  %p4548_p9 = por %p4547_p8, %p4546_p6 }
  0x5b   : > { %p4542_p4 = pneg %p4541_p2 }
  0x5d   : > { %p4549_p10 = pnand %p4548_p9, %p4542_p4 }
  0x5f   : > { %4552 = shalt.err (!%p4549_p10)
}
  0x60   : > { %4241 = dma.hbm_to_vmem [thread:$0]  (!%p5252_p5), %s6152_s5, 64, %s5256_s4, [#allocation13]  }
  0x61   : > { %s6153_s7 = sld [smem:[#allocation56_spill]] }
  0x67   : > { %s4553_s21 = scalar_lea.hbm %s6153_s7, 4096 }
  0x68   : > { %p4554_p11 = scmp.ne.s32.totalorder %s6153_s7, %s4553_s21  ;;  %p4560_p0 = scmp.lt.u32.totalorder %s4553_s21, %s6153_s7 }
  0x6a   : > { %p4556_p12 = pnand %p4554_p11, %p5268_p7 }
  0x6c   : > { %p4557_p13 = pneg %p4556_p12 }
  0x6e   : > { %p4562_p2 = pnand %p4560_p0, %p4557_p13 }
  0x70   : > { %4565 = shalt.err (!%p4562_p2)
}
  0x71   : > { %s4566_s4 = scalar_lea.vmem %s5258_s0, 4096  ;;  %p4574_p9 = scmp.lt.s32.totalorder %s5258_s0, %s5258_s0 }
  0x72   : > { %p4567_p4 = scmp.ne.s32.totalorder %s5258_s0, %s4566_s4  ;;  %p4575_p10 = scmp.lt.s32.totalorder %s4566_s4, %s4566_s4 }
  0x74   : > { %p4569_p6 = pnand %p4567_p4, %p5268_p7  ;;  %p4576_p11 = por %p4575_p10, %p4574_p9 }
  0x76   : > { %p4570_p8 = pneg %p4569_p6 }
  0x78   : > { %p4577_p12 = pnand %p4576_p11, %p4570_p8 }
  0x7a   : > { %4580 = shalt.err (!%p4577_p12)
}
  0x7b   : > { %4247 = dma.hbm_to_vmem [thread:$0]  (!%p5252_p5), %s6153_s7, 4096, %s5258_s0, [#allocation16], %s6105_s19, %s6105_s19, %s6107_s20  }
  0x7c   : > { %s5088_s16 = smov [#allocation18]   ;;  %s5089_s27 = smov [#allocation21]  }
  0x7d   : > { %s607_s17 = sshll.u32 %s5088_s16, 4  ;;  %s634_s21 = sshll.u32 %s5089_s27, 4  ;;  %s608_s17 = int_to_ptr.vmem [resolvable:$true] %s607_s17  ;;  %s635_s21 = int_to_ptr.vmem [resolvable:$true] %s634_s21 }
  0x7e   : > { %s6154_s9 = sld [smem:[#allocation58_spill]] }
  0x84   : > { %s4581_s30 = scalar_lea.hbm %s6154_s9, 4096 }
  0x85   : > { %p4582_p13 = scmp.ne.s32.totalorder %s6154_s9, %s4581_s30  ;;  %p4588_p4 = scmp.lt.u32.totalorder %s4581_s30, %s6154_s9 }
  0x87   : > { %p4584_p0 = pnand %p4582_p13, %p5268_p7 }
  0x89   : > { %p4585_p2 = pneg %p4584_p0 }
  0x8b   : > { %p4590_p6 = pnand %p4588_p4, %p4585_p2 }
  0x8d   : > { %4593 = shalt.err (!%p4590_p6)
}
  0x8e   : > { %s4594_s0 = scalar_lea.vmem %s608_s17, 4096  ;;  %p4602_p11 = scmp.lt.s32.totalorder %s608_s17, %s608_s17 }
  0x8f   : > { %p4595_p8 = scmp.ne.s32.totalorder %s608_s17, %s4594_s0  ;;  %p4603_p12 = scmp.lt.s32.totalorder %s4594_s0, %s4594_s0 }
  0x91   : > { %p4597_p9 = pnand %p4595_p8, %p5268_p7  ;;  %p4604_p1 = por %p4603_p12, %p4602_p11 }
  0x93   : > { %p4598_p10 = pneg %p4597_p9 }
  0x95   : > { %p4605_p3 = pnand %p4604_p1, %p4598_p10 }
  0x97   : > { %4608 = shalt.err (!%p4605_p3)
}
  0x98   : > { %4253 = dma.hbm_to_vmem [thread:$0]  (!%p5252_p5), %s6154_s9, 4096, %s608_s17, [#allocation19], %s6105_s19, %s6105_s19, %s6107_s20  }
  0x99   : > { %s6155_s11 = sld [smem:[#allocation59_spill]] }
  0x9f   : > { %s4609_s1 = scalar_lea.hbm %s6155_s11, 16 }
  0xa0   : > { %p4610_p1 = scmp.ne.s32.totalorder %s6155_s11, %s4609_s1  ;;  %p4616_p0 = scmp.lt.u32.totalorder %s4609_s1, %s6155_s11 }
  0xa2   : > { %p4612_p3 = pnand %p4610_p1, %p5268_p7 }
  0xa4   : > { %p4613_p13 = pneg %p4612_p3 }
  0xa6   : > { %p4618_p2 = pnand %p4616_p0, %p4613_p13 }
  0xa8   : > { %4621 = shalt.err (!%p4618_p2)
}
  0xa9   : > { %s4622_s3 = scalar_lea.vmem %s635_s21, 16  ;;  %s4629_s17 = scalar_lea.vmem %s635_s21, 32 }
  0xaa   : > { %p4623_p4 = scmp.ne.s32.totalorder %s635_s21, %s4622_s3  ;;  %p4630_p9 = scmp.lt.s32.totalorder %s635_s21, %s635_s21 }
  0xab   : > { %p4631_p10 = scmp.lt.s32.totalorder %s4629_s17, %s4622_s3 }
  0xac   : > { %p4625_p6 = pnand %p4623_p4, %p5268_p7 }
  0xad   : > { %p4632_p11 = por %p4631_p10, %p4630_p9 }
  0xae   : > { %p4626_p8 = pneg %p4625_p6 }
  0xb0   : > { %p4633_p12 = pnand %p4632_p11, %p4626_p8 }
  0xb2   : > { %4636 = shalt.err (!%p4633_p12)
}
  0xb3   : > { %4259 = dma.hbm_to_vmem [thread:$0]  (!%p5252_p5), %s6155_s11, 16, %s635_s21, [#allocation22]  }
  0xb4   : > { %s5090_s15 = smov [#allocation24]   ;;  %s6156_s14 = sld [smem:[#allocation60_spill]] }
  0xb5   : > { %s661_s16 = sshll.u32 %s5090_s15, 4  ;;  %s662_s16 = int_to_ptr.vmem [resolvable:$true] %s661_s16 }
  0xba   : > { %s4637_s25 = scalar_lea.hbm %s6156_s14, 16 }
  0xbb   : > { %p4638_p1 = scmp.ne.s32.totalorder %s6156_s14, %s4637_s25  ;;  %p4644_p0 = scmp.lt.u32.totalorder %s4637_s25, %s6156_s14 }
  0xbd   : > { %p4640_p3 = pnand %p4638_p1, %p5268_p7 }
  0xbf   : > { %p4641_p13 = pneg %p4640_p3 }
  0xc1   : > { %p4646_p2 = pnand %p4644_p0, %p4641_p13 }
  0xc3   : > { %4649 = shalt.err (!%p4646_p2)
}
  0xc4   : > { %s4650_s21 = scalar_lea.vmem %s662_s16, 16  ;;  %s4657_s17 = scalar_lea.vmem %s662_s16, 32 }
  0xc5   : > { %p4651_p4 = scmp.ne.s32.totalorder %s662_s16, %s4650_s21  ;;  %p4658_p9 = scmp.lt.s32.totalorder %s662_s16, %s662_s16 }
  0xc6   : > { %p4659_p10 = scmp.lt.s32.totalorder %s4657_s17, %s4650_s21 }
  0xc7   : > { %p4653_p6 = pnand %p4651_p4, %p5268_p7 }
  0xc8   : > { %p4660_p11 = por %p4659_p10, %p4658_p9 }
  0xc9   : > { %p4654_p8 = pneg %p4653_p6 }
  0xcb   : > { %p4661_p12 = pnand %p4660_p11, %p4654_p8 }
  0xcd   : > { %4664 = shalt.err (!%p4661_p12)
}
  0xce   : > { %4265 = dma.hbm_to_vmem [thread:$0]  (!%p5252_p5), %s6156_s14, 16, %s662_s16, [#allocation25]  }
  0xcf   : > { %s3475_s15 = sadd.s32 4294967294, %s5081_s2   ;;  %s5400_s27 = sadd.s32 1, %s5081_s2  }
  0xd0   : > { %6157 = sst [smem:[#allocation46_spill]] %s5400_s27  ;;  %s56_s1 = ssub.s32 %s5081_s2, %s5400_s27 }
  0xd1   : > { %s59_s25 = sadd.s32 1, %s5077_s12  ;;  %p57_p1 = scmp.eq.s32.totalorder %s56_s1, 0 }
  0xd2   : > { %p66_p3 = scmp.ne.s32.totalorder %s5077_s12, %s5073_s24  ;;  %p67_p13 = scmp.eq.s32.totalorder %s5081_s2, 0 }
  0xd3   : > { %p72_p0 = scmp.ne.s32.totalorder %s5073_s24, %s5069_s23  ;;  %p6159_p4 = scmp.eq.s32.totalorder %s5237_s26, 0 }
  0xd4   : > { %s5411_s30 = scalar_select %p57_p1, %s5077_s12, %s59_s25  }
  0xd5   : > { %p68_p2 = por %p67_p13, %p66_p3  ;;  %p5415_p6 = por %p6159_p4, %p72_p0 }
  0xd6   : > { %6158 = sst [smem:[#allocation47_spill]] %s5411_s30  ;;  %p484_p8 = scmp.eq.s32.totalorder %s5237_s26, 3 }
  0xd7   : > { %s6160_s18 = scalar_select %p5415_p6, 1, 0 }
  0xd8   : > { %p490_p9 = scmp.eq.s32.totalorder %s3475_s15, 3  ;;  %p4302_p10 = scmp.lt.s32.totalorder %s5081_s2, 4 }
  0xd9   : > { %s5422_s16 = sand.u32 1, %s5077_s12   ;;  %p5424_p11 = por %p484_p8, %p66_p3 }
  0xda   : > { %p5428_p12 = por %p490_p9, %p72_p0  ;;  %p5432_p1 = pnand %p4302_p10, %p68_p2 }
  0xdb   : > { %s6161_s4 = scalar_select %p5424_p11, 1, 0 }
  0xdc   : > { %s6162_s3 = scalar_select %p5428_p12, 1, 0 }
  0xdd   : > { %s6164_s21 = scalar_select %p5432_p1, 1, 0 }
  0xde   : > { %6163 = sst [smem:[#allocation48_spill]] %s6162_s3  ;;  %s720_s17 = sand.u32 1, %s5081_s2  }
  0xdf   : > { %s3493_s0 = sshll.u32 %s5422_s16, 2  ;;  %s3494_s5 = sshll.u32 %s5081_s2, 6 }
  0xe0   : > { %s724_s15 = scalar_lea.vmem [#allocation6], %s3493_s0  ;;  %s6165_s20 = sld [smem:[#allocation50_spill]] }
  0xe1   : > { %s731_s1 = sshll.u32 %s724_s15, 4  ;;  %s5446_s9 = scalar_lea.sflag [#allocation7], %s720_s17  ;;  %s5444_s1 = int_to_ptr.vmem [resolvable:$true] %s731_s1 }
  0xe2   : > { %p5452_p13 = pneg %p5432_p1 }
  0xe4   : > { %s6166_s14 = scalar_select %p5452_p13, 1, 0 }
  0xe6   : > { %s5442_s7 = scalar_lea.hbm %s6165_s20, %s3494_s5  ;;  %s4670_s5 = scalar_lea.hbm %s6165_s20, 256 }
  0xe7   : > { %s4665_s11 = scalar_lea.hbm %s5442_s7, 64  ;;  %p4671_p4 = scmp.lt.u32.totalorder %s5442_s7, %s6165_s20 }
  0xe8   : > { %p4666_p3 = scmp.ne.s32.totalorder %s5442_s7, %s4665_s11  ;;  %p4672_p8 = scmp.lt.u32.totalorder %s4670_s5, %s4665_s11 }
  0xe9   : > { %p4674_p10 = scmp.lt.u32.totalorder %s4665_s11, %s5442_s7 }
  0xea   : > { %p4668_p0 = pnand %p5452_p13, %p4666_p3  ;;  %p4673_p9 = por %p4672_p8, %p4671_p4 }
  0xec   : > { %p4669_p2 = pneg %p4668_p0  ;;  %p4675_p12 = por %p4674_p10, %p4673_p9 }
  0xee   : > { %p4676_p11 = pnand %p4675_p12, %p4669_p2 }
  0xf0   : > { %4679 = shalt.err (!%p4676_p11)
}
  0xf1   : > { %s4680_s17 = scalar_lea.vmem %s5444_s1, 64  ;;  %s5091_s19 = smov [#allocation6]  }
  0xf2   : > { %p4681_p3 = scmp.ne.s32.totalorder %s5444_s1, %s4680_s17  ;;  %s4685_s0 = sshll.u32 %s5091_s19, 4  ;;  %s4686_s0 = int_to_ptr.vmem [resolvable:$false] %s4685_s0 }
  0xf3   : > { %s4687_s15 = scalar_lea.vmem %s4686_s0, 128  ;;  %p4688_p5 = scmp.lt.s32.totalorder %s5444_s1, %s4686_s0 }
  0xf4   : > { %p4683_p0 = pnand %p4681_p3, %p5452_p13  ;;  %p4689_p7 = scmp.lt.s32.totalorder %s4687_s15, %s4680_s17 }
  0xf6   : > { %p4684_p6 = pneg %p4683_p0  ;;  %p4690_p4 = por %p4689_p7, %p4688_p5 }
  0xf8   : > { %p4691_p8 = pnand %p4690_p4, %p4684_p6 }
  0xfa   : > { %4694 = shalt.err (!%p4691_p8)
}
  0xfb   : > { %4278 = dma.hbm_to_vmem [thread:$0]  (!%p5432_p1), %s5442_s7, 64, %s5444_s1, %s5446_s9  }
  0xfc   : > { %s5092_s5 = smov [#allocation11]   ;;  %s5093_s19 = smov [#allocation14]  }
  0xfd   : > { %s549_s25 = sshll.u32 %s5092_s5, 4  ;;  %s571_s20 = sshll.u32 %s5093_s19, 4  ;;  %s550_s25 = int_to_ptr.vmem [resolvable:$true] %s549_s25  ;;  %s572_s20 = int_to_ptr.vmem [resolvable:$true] %s571_s20 }
  0xfe   : > { %s6167_s17 = sld [smem:[#allocation53_spill]]  ;;  %p6168_p7 = scmp.ne.s32.totalorder %s6151_s28, 0 }
 0x104   : > { %s4695_s15 = scalar_lea.hbm %s6167_s17, 16 }
 0x105   : > { %p4696_p5 = scmp.ne.s32.totalorder %s6167_s17, %s4695_s15  ;;  %p4702_p12 = scmp.lt.u32.totalorder %s4695_s15, %s6167_s17 }
 0x107   : > { %p4698_p6 = pnand %p4696_p5, %p6168_p7 }
 0x109   : > { %p4699_p11 = pneg %p4698_p6 }
 0x10b   : > { %p4704_p2 = pnand %p4702_p12, %p4699_p11 }
 0x10d   : > { %4707 = shalt.err (!%p4704_p2)
}
 0x10e   : > { %s4708_s7 = scalar_lea.vmem %s550_s25, 16  ;;  %s4715_s22 = scalar_lea.vmem %s550_s25, 32 }
 0x10f   : > { %p4709_p9 = scmp.ne.s32.totalorder %s550_s25, %s4708_s7  ;;  %p4716_p0 = scmp.lt.s32.totalorder %s550_s25, %s550_s25 }
 0x110   : > { %p4717_p4 = scmp.lt.s32.totalorder %s4715_s22, %s4708_s7 }
 0x111   : > { %p4711_p10 = pnand %p4709_p9, %p6168_p7 }
 0x112   : > { %p4718_p8 = por %p4717_p4, %p4716_p0 }
 0x113   : > { %p4712_p3 = pneg %p4711_p10 }
 0x115   : > { %p4719_p1 = pnand %p4718_p8, %p4712_p3 }
 0x117   : > { %4722 = shalt.err (!%p4719_p1)
}
 0x118   : > { %p6169_p5 = scmp.ne.s32.totalorder %s6149_s29, 0  ;;  %s6170_s6 = sld [smem:[#allocation55_spill]] }
 0x11a   : > { %4238 = dma.hbm_to_vmem [thread:$0]  (!%p6169_p5), %s6167_s17, 16, %s550_s25, [#allocation10]  }
 0x11e   : > { %s4723_s1 = scalar_lea.hbm %s6170_s6, 16 }
 0x11f   : > { %p4724_p6 = scmp.ne.s32.totalorder %s6170_s6, %s4723_s1  ;;  %p4730_p1 = scmp.lt.u32.totalorder %s4723_s1, %s6170_s6 }
 0x121   : > { %p4726_p11 = pnand %p4724_p6, %p6168_p7 }
 0x123   : > { %p4727_p12 = pneg %p4726_p11 }
 0x125   : > { %p4732_p2 = pnand %p4730_p1, %p4727_p12 }
 0x127   : > { %4735 = shalt.err (!%p4732_p2)
}
 0x128   : > { %s4736_s7 = scalar_lea.vmem %s572_s20, 16  ;;  %s4743_s25 = scalar_lea.vmem %s572_s20, 32 }
 0x129   : > { %p4737_p9 = scmp.ne.s32.totalorder %s572_s20, %s4736_s7  ;;  %p4744_p0 = scmp.lt.s32.totalorder %s572_s20, %s572_s20 }
 0x12a   : > { %p4745_p4 = scmp.lt.s32.totalorder %s4743_s25, %s4736_s7 }
 0x12b   : > { %p4739_p10 = pnand %p4737_p9, %p6168_p7 }
 0x12c   : > { %p4746_p8 = por %p4745_p4, %p4744_p0 }
 0x12d   : > { %p4740_p3 = pneg %p4739_p10 }
 0x12f   : > { %p4747_p13 = pnand %p4746_p8, %p4740_p3 }
 0x131   : > { %4750 = shalt.err (!%p4747_p13)
}
 0x132   : > { %4244 = dma.hbm_to_vmem [thread:$0]  (!%p6169_p5), %s6170_s6, 16, %s572_s20, [#allocation13]  }
 0x133   : > { %s5094_s30 = smov [#allocation17]   ;;  %s5095_s3 = smov [#allocation20]  }
 0x134   : > { %s594_s27 = sshll.u32 %s5094_s30, 4  ;;  %s620_s1 = sshll.u32 %s5095_s3, 4  ;;  %s595_s27 = int_to_ptr.vmem [resolvable:$true] %s594_s27  ;;  %s621_s1 = int_to_ptr.vmem [resolvable:$true] %s620_s1 }
 0x135   : > { %s6171_s8 = sld [smem:[#allocation57_spill]] }
 0x13b   : > { %s4751_s0 = scalar_lea.hbm %s6171_s8, 4096 }
 0x13c   : > { %p4752_p13 = scmp.ne.s32.totalorder %s6171_s8, %s4751_s0  ;;  %p4758_p12 = scmp.lt.u32.totalorder %s4751_s0, %s6171_s8 }
 0x13e   : > { %p4754_p6 = pnand %p4752_p13, %p6168_p7 }
 0x140   : > { %p4755_p11 = pneg %p4754_p6 }
 0x142   : > { %p4760_p1 = pnand %p4758_p12, %p4755_p11 }
 0x144   : > { %4763 = shalt.err (!%p4760_p1)
}
 0x145   : > { %s4764_s20 = scalar_lea.vmem %s595_s27, 4096  ;;  %p4772_p3 = scmp.lt.s32.totalorder %s595_s27, %s595_s27 }
 0x146   : > { %p4765_p2 = scmp.ne.s32.totalorder %s595_s27, %s4764_s20  ;;  %p4773_p0 = scmp.lt.s32.totalorder %s4764_s20, %s4764_s20 }
 0x148   : > { %p4767_p9 = pnand %p4765_p2, %p6168_p7  ;;  %p4774_p4 = por %p4773_p0, %p4772_p3 }
 0x14a   : > { %p4768_p10 = pneg %p4767_p9 }
 0x14c   : > { %p4775_p8 = pnand %p4774_p4, %p4768_p10 }
 0x14e   : > { %4778 = shalt.err (!%p4775_p8)
}
 0x14f   : > { %s6172_s12 = smov 4   ;;  %s6173_s30 = smov 64  }
 0x150   : > { %4250 = dma.hbm_to_vmem [thread:$0]  (!%p6169_p5), %s6171_s8, 4096, %s595_s27, [#allocation16], %s6173_s30, %s6173_s30, %s6172_s12  }
 0x151   : > { %s4779_s15 = scalar_lea.hbm %s6081_s10, 64 }
 0x152   : > { %p4780_p13 = scmp.ne.s32.totalorder %s6081_s10, %s4779_s15  ;;  %p4786_p12 = scmp.lt.u32.totalorder %s4779_s15, %s6081_s10 }
 0x154   : > { %p4782_p6 = pnand %p4780_p13, %p6168_p7 }
 0x156   : > { %p4783_p11 = pneg %p4782_p6 }
 0x158   : > { %p4788_p1 = pnand %p4786_p12, %p4783_p11 }
 0x15a   : > { %4791 = shalt.err (!%p4788_p1)
}
 0x15b   : > { %s4792_s3 = scalar_lea.vmem %s621_s1, 64  ;;  %p4800_p3 = scmp.lt.s32.totalorder %s621_s1, %s621_s1 }
 0x15c   : > { %p4793_p2 = scmp.ne.s32.totalorder %s621_s1, %s4792_s3  ;;  %p4801_p0 = scmp.lt.s32.totalorder %s4792_s3, %s4792_s3 }
 0x15e   : > { %p4795_p9 = pnand %p4793_p2, %p6168_p7  ;;  %p4802_p4 = por %p4801_p0, %p4800_p3 }
 0x160   : > { %p4796_p10 = pneg %p4795_p9 }
 0x162   : > { %p4803_p8 = pnand %p4802_p4, %p4796_p10 }
 0x164   : > { %4806 = shalt.err (!%p4803_p8)
}
 0x165   : > { %s5096_s27 = smov 16   ;;  %s5097_s5 = smov 1  }
 0x166   : > { %4256 = dma.hbm_to_vmem [thread:$0]  (!%p6169_p5), %s6081_s10, 64, %s621_s1, [#allocation19], %s5096_s27, %s5096_s27, %s5097_s5  }
 0x167   : > { %s5098_s15 = smov [#allocation23]   ;;  %s5099_s25 = smov [#allocation26]  }
 0x168   : > { %s647_s7 = sshll.u32 %s5098_s15, 4  ;;  %s671_s22 = sshll.u32 %s5099_s25, 4  ;;  %s648_s7 = int_to_ptr.vmem [resolvable:$true] %s647_s7  ;;  %s672_s22 = int_to_ptr.vmem [resolvable:$true] %s671_s22 }
 0x169   : > { %s4807_s3 = scalar_lea.hbm %s6084_s13, 1024 }
 0x16a   : > { %p4808_p13 = scmp.ne.s32.totalorder %s6084_s13, %s4807_s3  ;;  %p4814_p12 = scmp.lt.u32.totalorder %s4807_s3, %s6084_s13 }
 0x16c   : > { %p4810_p6 = pnand %p4808_p13, %p6168_p7 }
 0x16e   : > { %p4811_p11 = pneg %p4810_p6 }
 0x170   : > { %p4816_p1 = pnand %p4814_p12, %p4811_p11 }
 0x172   : > { %4819 = shalt.err (!%p4816_p1)
}
 0x173   : > { %s4820_s1 = scalar_lea.vmem %s648_s7, 1024  ;;  %p4828_p3 = scmp.lt.s32.totalorder %s648_s7, %s648_s7 }
 0x174   : > { %p4821_p2 = scmp.ne.s32.totalorder %s648_s7, %s4820_s1  ;;  %p4829_p0 = scmp.lt.s32.totalorder %s4820_s1, %s4820_s1 }
 0x176   : > { %p4823_p9 = pnand %p4821_p2, %p6168_p7  ;;  %p4830_p4 = por %p4829_p0, %p4828_p3 }
 0x178   : > { %p4824_p10 = pneg %p4823_p9 }
 0x17a   : > { %p4831_p8 = pnand %p4830_p4, %p4824_p10 }
 0x17c   : > { %4834 = shalt.err (!%p4831_p8)
}
 0x17d   : > { %4262 = dma.hbm_to_vmem [thread:$0]  (!%p6169_p5), %s6084_s13, 1024, %s648_s7, [#allocation22], %s6173_s30, %s6173_s30, %s6172_s12  }
 0x17e   : > { %s6174_s17 = sld [smem:[#allocation61_spill]] }
 0x184   : > { %s4835_s27 = scalar_lea.hbm %s6174_s17, 1024 }
 0x185   : > { %p4836_p13 = scmp.ne.s32.totalorder %s6174_s17, %s4835_s27  ;;  %p4842_p12 = scmp.lt.u32.totalorder %s4835_s27, %s6174_s17 }
 0x187   : > { %p4838_p6 = pnand %p4836_p13, %p6168_p7 }
 0x189   : > { %p4839_p11 = pneg %p4838_p6 }
 0x18b   : > { %p4844_p1 = pnand %p4842_p12, %p4839_p11 }
 0x18d   : > { %4847 = shalt.err (!%p4844_p1)
}
 0x18e   : > { %s4848_s25 = scalar_lea.vmem %s672_s22, 1024  ;;  %p4856_p3 = scmp.lt.s32.totalorder %s672_s22, %s672_s22 }
 0x18f   : > { %p4849_p2 = scmp.ne.s32.totalorder %s672_s22, %s4848_s25  ;;  %p4857_p0 = scmp.lt.s32.totalorder %s4848_s25, %s4848_s25 }
 0x191   : > { %p4851_p9 = pnand %p4849_p2, %p6168_p7  ;;  %p4858_p4 = por %p4857_p0, %p4856_p3 }
 0x193   : > { %p4852_p10 = pneg %p4851_p9 }
 0x195   : > { %p4859_p8 = pnand %p4858_p4, %p4852_p10 }
 0x197   : > { %4862 = shalt.err (!%p4859_p8)
}
 0x198   : > { %4268 = dma.hbm_to_vmem [thread:$0]  (!%p6169_p5), %s6174_s17, 1024, %s672_s22, [#allocation25], %s6173_s30, %s6173_s30, %s6172_s12  }
 0x199   : > { %s5100_s3 = smov [#allocation27]   ;;  %s3491_s6 = sshll.u32 %s5422_s16, 3 }
 0x19a   : > { %s685_s1 = sshll.u32 %s5100_s3, 4  ;;  %s6175_s11 = sld [smem:[#allocation62_spill]]  ;;  %s686_s1 = int_to_ptr.vmem [resolvable:$true] %s685_s1 }
 0x1a0   : > { %s4863_s27 = scalar_lea.hbm %s6175_s11, 16 }
 0x1a1   : > { %p4864_p13 = scmp.ne.s32.totalorder %s6175_s11, %s4863_s27  ;;  %p4870_p12 = scmp.lt.u32.totalorder %s4863_s27, %s6175_s11 }
 0x1a3   : > { %p4866_p6 = pnand %p4864_p13, %p6168_p7 }
 0x1a5   : > { %p4867_p11 = pneg %p4866_p6 }
 0x1a7   : > { %p4872_p1 = pnand %p4870_p12, %p4867_p11 }
 0x1a9   : > { %4875 = shalt.err (!%p4872_p1)
}
 0x1aa   : > { %s4876_s22 = scalar_lea.vmem %s686_s1, 16  ;;  %s4883_s25 = scalar_lea.vmem %s686_s1, 32 }
 0x1ab   : > { %p4877_p2 = scmp.ne.s32.totalorder %s686_s1, %s4876_s22  ;;  %p4884_p3 = scmp.lt.s32.totalorder %s686_s1, %s686_s1 }
 0x1ac   : > { %p4885_p0 = scmp.lt.s32.totalorder %s4883_s25, %s4876_s22 }
 0x1ad   : > { %p4879_p9 = pnand %p4877_p2, %p6168_p7 }
 0x1ae   : > { %p4886_p4 = por %p4885_p0, %p4884_p3 }
 0x1af   : > { %p4880_p10 = pneg %p4879_p9 }
 0x1b1   : > { %p4887_p8 = pnand %p4886_p4, %p4880_p10 }
 0x1b3   : > { %4890 = shalt.err (!%p4887_p8)
}
 0x1b4   : > { %4271 = dma.hbm_to_vmem [thread:$0]  (!%p6169_p5), %s6175_s11, 16, %s686_s1, [#allocation28]  }
 0x1b5   : > { %s3492_s3 = sshll.u32 %s5081_s2, 7  ;;  %s6176_s23 = sld [smem:[#allocation49_spill]] }
 0x1b6   : > { %s706_s19 = scalar_lea.vmem [#allocation3], %s3491_s6  ;;  %s703_s29 = scalar_lea.sflag [#allocation4], %s5422_s16 }
 0x1b7   : > { %s713_s0 = sshll.u32 %s706_s19, 4  ;;  %p6178_p13 = scmp.ne.s32.totalorder %s6166_s14, 0  ;;  %s714_s0 = int_to_ptr.vmem [resolvable:$true] %s713_s0 }
 0x1bb   : > { %s6177_s27 = smov %s6176_s23  ;;  %s5617_s5 = scalar_lea.hbm %s6176_s23, %s3492_s3 }
 0x1bc   : > { %s4891_s15 = scalar_lea.hbm %s5617_s5, 128  ;;  %s4896_s25 = scalar_lea.hbm %s6177_s27, 512 }
 0x1bd   : > { %p4892_p7 = scmp.ne.s32.totalorder %s5617_s5, %s4891_s15  ;;  %p4897_p5 = scmp.lt.u32.totalorder %s5617_s5, %s6177_s27 }
 0x1be   : > { %p4898_p12 = scmp.lt.u32.totalorder %s4896_s25, %s4891_s15  ;;  %p4900_p2 = scmp.lt.u32.totalorder %s4891_s15, %s5617_s5 }
 0x1bf   : > { %p4894_p6 = pnand %p4892_p7, %p6178_p13 }
 0x1c0   : > { %p4899_p1 = por %p4898_p12, %p4897_p5 }
 0x1c1   : > { %p4895_p11 = pneg %p4894_p6 }
 0x1c2   : > { %p4901_p9 = por %p4900_p2, %p4899_p1 }
 0x1c4   : > { %p4902_p10 = pnand %p4901_p9, %p4895_p11 }
 0x1c6   : > { %4905 = shalt.err (!%p4902_p10)
}
 0x1c7   : > { %s4906_s6 = scalar_lea.vmem %s714_s0, 128  ;;  %s5101_s3 = smov [#allocation3]  }
 0x1c8   : > { %p4907_p3 = scmp.ne.s32.totalorder %s714_s0, %s4906_s6  ;;  %s4911_s8 = sshll.u32 %s5101_s3, 4  ;;  %s4912_s8 = int_to_ptr.vmem [resolvable:$false] %s4911_s8 }
 0x1c9   : > { %s4913_s28 = scalar_lea.vmem %s4912_s8, 256  ;;  %p4914_p8 = scmp.lt.s32.totalorder %s714_s0, %s4912_s8 }
 0x1ca   : > { %p4909_p0 = pnand %p4907_p3, %p6178_p13  ;;  %p4915_p7 = scmp.lt.s32.totalorder %s4913_s28, %s4906_s6 }
 0x1cc   : > { %p4910_p4 = pneg %p4909_p0  ;;  %p4916_p6 = por %p4915_p7, %p4914_p8 }
 0x1ce   : > { %p4917_p5 = pnand %p4916_p6, %p4910_p4 }
 0x1d0   : > { %4920 = shalt.err (!%p4917_p5)
}
 0x1d1   : > { %p6179_p12 = scmp.ne.s32.totalorder %s6164_s21, 0  ;;  %s3653_s23 = sshll.u32 %s5081_s2, 9 }
 0x1d2   : > { %s6180_s19 = sshll.u32 %s5422_s16, 5  ;;  %s6181_s7 = sld [smem:[#allocation51_spill]] }
 0x1d3   : > { %4275 = dma.hbm_to_vmem [thread:$0]  (!%p6179_p12), %s5617_s5, 128, %s714_s0, %s703_s29  }
 0x1d4   : > { %s742_s15 = scalar_lea.vmem [#allocation8], %s6180_s19 }
 0x1d5   : > { %s749_s1 = sshll.u32 %s742_s15, 4  ;;  %s5645_s1 = int_to_ptr.vmem [resolvable:$true] %s749_s1 }
 0x1d8   : > { %s5643_s20 = scalar_lea.hbm %s6181_s7, %s3653_s23  ;;  %s4926_s0 = scalar_lea.hbm %s6181_s7, 2048 }
 0x1d9   : > { %s4921_s6 = scalar_lea.hbm %s5643_s20, 512  ;;  %p4927_p9 = scmp.lt.u32.totalorder %s5643_s20, %s6181_s7 }
 0x1da   : > { %p4922_p11 = scmp.ne.s32.totalorder %s5643_s20, %s4921_s6  ;;  %p4928_p10 = scmp.lt.u32.totalorder %s4926_s0, %s4921_s6 }
 0x1db   : > { %p4930_p0 = scmp.lt.u32.totalorder %s4921_s6, %s5643_s20 }
 0x1dc   : > { %p4924_p1 = pnand %p4922_p11, %p6178_p13  ;;  %p4929_p3 = por %p4928_p10, %p4927_p9 }
 0x1de   : > { %p4925_p2 = pneg %p4924_p1  ;;  %p4931_p4 = por %p4930_p0, %p4929_p3 }
 0x1e0   : > { %p4932_p8 = pnand %p4931_p4, %p4925_p2 }
 0x1e2   : > { %4935 = shalt.err (!%p4932_p8)
}
 0x1e3   : > { %s4936_s8 = scalar_lea.vmem %s5645_s1, 512  ;;  %s5102_s28 = smov [#allocation8]  }
 0x1e4   : > { %p4937_p7 = scmp.ne.s32.totalorder %s5645_s1, %s4936_s8  ;;  %s4941_s23 = sshll.u32 %s5102_s28, 4  ;;  %s4942_s23 = int_to_ptr.vmem [resolvable:$false] %s4941_s23 }
 0x1e5   : > { %s4943_s19 = scalar_lea.vmem %s4942_s23, 1024  ;;  %p4944_p11 = scmp.lt.s32.totalorder %s5645_s1, %s4942_s23 }
 0x1e6   : > { %p4939_p6 = pnand %p4937_p7, %p6178_p13  ;;  %p4945_p1 = scmp.lt.s32.totalorder %s4943_s19, %s4936_s8 }
 0x1e8   : > { %p4940_p5 = pneg %p4939_p6  ;;  %p4946_p9 = por %p4945_p1, %p4944_p11 }
 0x1ea   : > { %p4947_p10 = pnand %p4946_p9, %p4940_p5 }
 0x1ec   : > { %4950 = shalt.err (!%p4947_p10)
}
 0x1ed   : > { %4281 = dma.hbm_to_vmem [thread:$0]  (!%p6179_p12), %s5643_s20, 512, %s5645_s1, %s5446_s9, %s6173_s30, %s6173_s30, %s6172_s12  }
 0x1ee   : > { %s6182_s14 = sld [smem:[#allocation45_spill]] }
 0x1f4   : > { %p6183_p13 = scmp.ne.s32.totalorder %s6182_s14, 0 }
 0x1f5   : > { %s5675_s15 = sand.u32 (!%p6183_p13), 1, %s5073_s24   ;;  %p6184_p2 = scmp.ne.s32.totalorder (!%p6183_p13), %s6160_s18, 0 }
 0x1f6   : > { %761 = sbr.rel (%p6183_p13) target bundleno = 3991 (0xf97), region = 96  ;;  %s3499_s22 = sshll.u32 (!%p6183_p13), %s5675_s15, 3 }
 0x1f7   : > { %s764_s25 = scalar_lea.sflag (!%p6183_p13), [#allocation4], %s5675_s15  ;;  %s5679_s6 = scalar_lea.vmem (!%p6183_p13), [#allocation3], %s3499_s22 }
 0x1fd   : > { %5024 = dma.done.wait (%p6184_p2), %s764_s25, 128  }
 0x1fe   : > { %5026 = vsyncadd (%p6184_p2), %s764_s25, 4294967168  ;;  %s772_s9 = sand.u32 1, %s5237_s26   ;;  %s3500_s21 = sshll.u32 %s5675_s15, 2 }
 0x1ff   : > { %s773_s12 = scalar_lea.sflag [#allocation7], %s772_s9  ;;  %s5687_s30 = scalar_lea.vmem [#allocation6], %s3500_s21 }
 0x200   : > { %5028 = dma.done.wait (%p6184_p2), %s773_s12, 576  }
 0x201   : > { %5030 = vsyncadd (%p6184_p2), %s773_s12, 4294966720  ;;  %s3501_s1 = sshll.u32 %s5675_s15, 5  ;;  %p6185_p12 = scmp.eq.s32.totalorder %s5237_s26, 0 }
 0x202   : > { %s5694_s20 = scalar_lea.vmem [#allocation8], %s3501_s1 }
 0x203   : > { %5032 = dma.done.wait (%p6185_p12), [#allocation10], 144   ;;  %p6186_p3 = pmov %p6185_p12 }
 0x205   : > { %5034 = vsyncadd (%p6186_p3), [#allocation10], 4294967152  ;;  %p6187_p0 = pmov %p6186_p3 }
 0x207   : > { %5036 = dma.done.wait (%p6187_p0), [#allocation13], 80   ;;  %p6188_p4 = pmov %p6187_p0 }
 0x208   : > { %p6189_p8 = pmov %p6187_p0 }
 0x209   : > { %5038 = vsyncadd (%p6188_p4), [#allocation13], 4294967216 }
 0x20a   : > { %5040 = dma.done.wait (%p6189_p8), [#allocation16], 8192   ;;  %p6190_p7 = pmov %p6187_p0 }
 0x20b   : > { %p6191_p6 = pmov %p6187_p0 }
 0x20c   : > { %5042 = vsyncadd (%p6190_p7), [#allocation16], 4294959104 }
 0x20d   : > { %5044 = dma.done.wait (%p6191_p6), [#allocation19], 4160   ;;  %p6192_p5 = pmov %p6187_p0 }
 0x20e   : > { %p6193_p11 = pmov %p6187_p0 }
 0x20f   : > { %5046 = vsyncadd (%p6192_p5), [#allocation19], 4294963136 }
 0x210   : > { %5048 = dma.done.wait (%p6193_p11), [#allocation22], 1040   ;;  %p6194_p1 = pmov %p6187_p0 }
 0x211   : > { %p6195_p9 = pmov %p6187_p0 }
 0x212   : > { %5050 = vsyncadd (%p6194_p1), [#allocation22], 4294966256 }
 0x213   : > { %5052 = dma.done.wait (%p6195_p9), [#allocation25], 1040   ;;  %p6196_p10 = pmov %p6187_p0 }
 0x214   : > { %p6197_p13 = pmov %p6187_p0 }
 0x215   : > { %5054 = vsyncadd (%p6196_p10), [#allocation25], 4294966256 }
 0x216   : > { %5056 = dma.done.wait (%p6197_p13), [#allocation28], 16   ;;  %p6198_p2 = pmov %p6187_p0 }
 0x217   : > { %v986_v1 = vlaneseq  ;;  %v5103_v2 = vmov 0.0   ;;  %vm5104_vm0 = vmmov 0   ;;  %v4371_v7 = vld [vmem:[#allocation9] sm:$0xff]   ;;  %v908_v9 = vld [vmem:[%s5679_s6] sm:$0xff]  ;;  %vm926_vm1 = vcmask 130048   ;;  %v4381_v27 = vld [vmem:[#allocation17 + $0x8] sm:$0xff]  }
 0x218   : > { %5058 = vsyncadd (%p6198_p2), [#allocation28], 4294967280  ;;  %3824 = vmatprep.subr.bf16.mxu0 %v5103_v2  ;;  %3826 = vmatprep.mubr.msk.bf16.mxu0 %vm5104_vm0, %v5103_v2  ;;  %v910_v12 = vld [vmem:[%s5687_s30] sm:$0xf]  ;;  %v1118_v23 = vld [vmem:[#allocation12] sm:$0xf] }
 0x219   : > { %v5727_v3 = vshrl.u32 %v986_v1, 7  ;;  %3856 = vmatprep.subr.bf16.mxu1 %v5103_v2  ;;  %3872 = vmatprep.mubr.msk.bf16.mxu1 %vm5104_vm0, %v5103_v2  ;;  %vm1161_vm2 = vcmask 1043456   ;;  %vm1050_vm3 = vcmask 64512   ;;  %v4380_v26 = vld [vmem:[#allocation17] sm:$0xff]   ;;  %v4382_v28 = vld [vmem:[#allocation17 + $0x10] sm:$0xff]   ;;  %v4383_v29 = vld [vmem:[#allocation17 + $0x18] sm:$0xff]  }
 0x21a   : > { %3825 = vmatpush3.bf16.msra.mxu0 %v4371_v7  ;;  %v1163_v24 = vsel %vm1161_vm2, %v1118_v23, 0  ;;  %v1107_v25 = vsel %vm1050_vm3, %v908_v9, 0.0  ;;  %3857 = vmatpush3.bf16.msra.mxu1 %v4380_v26  ;;  %v4384_v30 = vld [vmem:[#allocation17 + $0x20] sm:$0xff]   ;;  %v4385_v31 = vld [vmem:[#allocation17 + $0x28] sm:$0xff]   ;;  %v3655_v32 = vld [vmem:[%s5694_s20] sm:$0xff]   ;;  %vm1143_vm4 = vcmask 1041409  }
 0x21b   : > { %v988_v4 = vsub.s32 0, %v5727_v3  ;;  %v1002_v5 = vsub.s32 2, %v5727_v3  ;;  %v995_v6 = vsub.s32 1, %v5727_v3  ;;  %v1009_v8 = vsub.s32 3, %v5727_v3  ;;  %3830 = vmatprep.subr.bf16.mxu0 %v5103_v2  ;;  %3858 = vmatprep.subr.bf16.mxu1 %v5103_v2  ;;  %v3670_v33 = vld [vmem:[%s5694_s20 + $0x8] sm:$0xff]   ;;  %v4386_v36 = vld [vmem:[#allocation17 + $0x30] sm:$0xff]  }
 0x21c   : > { %v1016_v13 = vsub.s32 4, %v5727_v3  ;;  %v1023_v14 = vsub.s32 5, %v5727_v3  ;;  %v1030_v19 = vsub.s32 6, %v5727_v3  ;;  %v1037_v20 = vsub.s32 7, %v5727_v3  ;;  %v3671_v43 = vld [vmem:[%s5694_s20 + $0x10] sm:$0xff]   ;;  %v3672_v56 = vld [vmem:[%s5694_s20 + $0x18] sm:$0xff]  }
 0x21d   : > { %v989_v10 = vrot.slane %v908_v9, %v988_v4  ;;  %v1003_v11 = vrot.slane %v908_v9, %v1002_v5  ;;  %v996_v15 = vrot.slane %v908_v9, %v995_v6  ;;  %v1010_v16 = vrot.slane %v908_v9, %v1009_v8  ;;  %3827 = vmatmul.mubr.msk.bf16.vlgmr.msra.gmra.mrb[0].mxu0 %vm926_vm1, %v910_v12  ;;  %s906_s18 = scalar_lea.vmem [#allocation30], %s5675_s15  ;;  %s6199_s0 = sld [smem:[#allocation63_spill]] }
 0x21e   : > { %3832 = vmatprep.mubr.msk.bf16.mxu0 %vm5104_vm0, %v5103_v2  ;;  %v1017_v17 = vrot.slane %v908_v9, %v1016_v13  ;;  %v1024_v18 = vrot.slane %v908_v9, %v1023_v14  ;;  %v1031_v21 = vrot.slane %v908_v9, %v1030_v19  ;;  %v1038_v22 = vrot.slane %v908_v9, %v1037_v20  ;;  %s3649_s1 = sshll.u32 %s5237_s26, 4  ;;  %s6200_s16 = sld [smem:[#allocation66_spill]] }
 0x21f   : > { %991 = vbcast.lane.b32.xlu0 %v989_v10, 256  ;;  %1005 = vbcast.lane.b32.xlu1 %v1003_v11, 256  ;;  %v3656_v34 = vunpack.c.l.bf16 %v3655_v32  ;;  %v3660_v35 = vunpack.c.l.bf16 %v3670_v33  ;;  %v3657_v41 = vunpack.c.h.bf16 %v3655_v32  ;;  %v3661_v42 = vunpack.c.h.bf16 %v3670_v33  ;;  %s3214_s3 = sshll.u32 %s906_s18, 4  ;;  %s3189_s8 = scalar_lea.sflag [#allocation31], %s5675_s15  ;;  %s3215_s3 = int_to_ptr.vmem [resolvable:$true] %s3214_s3 }
 0x220   : > { %3831 = vmatpush3.bf16.msra.mxu0 %v1163_v24  ;;  %3859 = vmatpush3.bf16.msra.mxu1 %v4381_v27  ;;  %v3664_v52 = vunpack.c.l.bf16 %v3671_v43  ;;  %v3665_v53 = vunpack.c.h.bf16 %v3671_v43  ;;  %v3668_v6 = vunpack.c.l.bf16 %v3672_v56  ;;  %v3669_v7 = vunpack.c.h.bf16 %v3672_v56  ;;  %s4951_s28 = scalar_lea.vmem %s3215_s3, 16  ;;  %p6201_p3 = scmp.ne.s32.totalorder %s6161_s4, 0 }
 0x221   : > { %3836 = vmatprep.subr.bf16.mxu0 %v5103_v2  ;;  %3860 = vmatprep.subr.bf16.mxu1 %v5103_v2  ;;  %vm1145_vm5 = vcmask 1042434   ;;  %vm1147_vm6 = vcmask 1043459   ;;  %vm1149_vm7 = vcmask 1044484   ;;  %vm1151_vm8 = vcmask 1045509   ;;  %p4952_p12 = scmp.ne.s32.totalorder %s3215_s3, %s4951_s28  ;;  %s5106_s23 = smov [#allocation30]  }
 0x222   : > { %vm1153_vm9 = vcmask 1046534   ;;  %vm1155_vm10 = vcmask 1047559   ;;  %vm2777_vm1 = vcmask 57344   ;;  %s4955_s19 = sshll.u32 %s5106_s23, 4  ;;  %s4956_s19 = int_to_ptr.vmem [resolvable:$false] %s4955_s19 }
 0x223   : > { %998 = vbcast.lane.b32.xlu0 %v996_v15, 256  ;;  %1012 = vbcast.lane.b32.xlu1 %v1010_v16, 256  ;;  %p4953_p0 = pnand %p4952_p12, %p6201_p3  ;;  %s4957_s14 = scalar_lea.vmem %s4956_s19, 32 }
 0x224   : > { %3861 = vmatpush3.bf16.msra.mxu1 %v4382_v28  ;;  %s5997_s29 = scalar_lea.hbm %s6200_s16, %s3649_s1  ;;  %p4958_p8 = scmp.lt.s32.totalorder %s3215_s3, %s4956_s19 }
 0x225   : > { %3862 = vmatprep.subr.bf16.mxu1 %v5103_v2  ;;  %p4954_p4 = pneg %p4953_p0  ;;  %p4959_p7 = scmp.lt.s32.totalorder %s4957_s14, %s4951_s28 }
 0x227   : > { %1019 = vbcast.lane.b32.xlu0 %v1017_v17, 256  ;;  %1026 = vbcast.lane.b32.xlu1 %v1024_v18, 256  ;;  %p4960_p6 = por %p4959_p7, %p4958_p8 }
 0x228   : > { %3863 = vmatpush3.bf16.msra.mxu1 %v4383_v29 }
 0x229   : > { %3864 = vmatprep.subr.bf16.mxu1 %v5103_v2  ;;  %p4961_p5 = pnand %p4960_p6, %p4954_p4 }
 0x22b   : > { %1033 = vbcast.lane.b32.xlu0 %v1031_v21, 256  ;;  %1040 = vbcast.lane.b32.xlu1 %v1038_v22, 256 }
 0x22c   : > { %3865 = vmatpush3.bf16.msra.mxu1 %v4384_v30 }
 0x22d   : > { %3866 = vmatprep.subr.bf16.mxu1 %v5103_v2 }
 0x230   : > { %3867 = vmatpush3.bf16.msra.mxu1 %v4385_v31 }
 0x231   : > { %3868 = vmatprep.subr.bf16.mxu1 %v5103_v2 }
 0x234   : > { %3869 = vmatpush3.bf16.msra.mxu1 %v4386_v36 }
 0x235   : > { %3870 = vmatprep.subr.bf16.mxu1 %v5103_v2 }
 0x24a   : > { %1108 = vadd.xlane.f32.xlu0 %v1107_v25 }
 0x291   : > { %v992_v37 = vpop.permute.xlu0 %991  ;;  %v1006_v38 = vpop.permute.xlu1 %1005 }
 0x292   : > { %v1042_v39 = vmul.f32 %v3656_v34, %v992_v37  ;;  %v1044_v40 = vmul.f32 %v3660_v35, %v1006_v38 }
 0x294   : > { %v1051_v44 = vsel %vm1050_vm3, %v1042_v39, 0.0  ;;  %v1065_v45 = vsel %vm1050_vm3, %v1044_v40, 0.0 }
 0x295   : > { %v1052_v46 = vrot.slane %v1051_v44, 4  ;;  %v1066_v47 = vrot.slane %v1065_v45, 4  ;;  %v999_v48 = vpop.permute.xlu0 %998  ;;  %v1013_v49 = vpop.permute.xlu1 %1012 }
 0x296   : > { %v1043_v50 = vmul.f32 %v3657_v41, %v999_v48  ;;  %v1045_v51 = vmul.f32 %v3661_v42, %v1013_v49 }
 0x297   : > { %v1053_v54 = vadd.f32 %v1052_v46, %v1051_v44  ;;  %v1067_v55 = vadd.f32 %v1066_v47, %v1065_v45 }
 0x298   : > { %v1058_v57 = vsel %vm1050_vm3, %v1043_v50, 0.0  ;;  %v1072_v58 = vsel %vm1050_vm3, %v1045_v51, 0.0 }
 0x299   : > { %v1054_v59 = vrot.slane %v1053_v54, 2  ;;  %v1068_v60 = vrot.slane %v1067_v55, 2  ;;  %v1059_v61 = vrot.slane %v1058_v57, 4  ;;  %v1073_v62 = vrot.slane %v1072_v58, 4  ;;  %v1020_v63 = vpop.permute.xlu0 %1019  ;;  %v1027_v0 = vpop.permute.xlu1 %1026 }
 0x29a   : > { %v1046_v1 = vmul.f32 %v3664_v52, %v1020_v63  ;;  %v1047_v5 = vmul.f32 %v3665_v53, %v1027_v0 }
 0x29b   : > { %v1055_v8 = vadd.f32 %v1054_v59, %v1053_v54  ;;  %v1069_v9 = vadd.f32 %v1068_v60, %v1067_v55  ;;  %v1060_v10 = vadd.f32 %v1059_v61, %v1058_v57  ;;  %v1074_v11 = vadd.f32 %v1073_v62, %v1072_v58 }
 0x29c   : > { %v1079_v12 = vsel %vm1050_vm3, %v1046_v1, 0.0  ;;  %v1086_v13 = vsel %vm1050_vm3, %v1047_v5, 0.0 }
 0x29d   : > { %v1056_v14 = vrot.slane %v1055_v8, 1  ;;  %v1070_v15 = vrot.slane %v1069_v9, 1  ;;  %v1061_v16 = vrot.slane %v1060_v10, 2  ;;  %v1075_v17 = vrot.slane %v1074_v11, 2  ;;  %v1034_v18 = vpop.permute.xlu0 %1033  ;;  %v1041_v19 = vpop.permute.xlu1 %1040 }
 0x29e   : > { %v1080_v20 = vrot.slane %v1079_v12, 4  ;;  %v1087_v21 = vrot.slane %v1086_v13, 4  ;;  %v1048_v22 = vmul.f32 %v3668_v6, %v1034_v18  ;;  %v1049_v23 = vmul.f32 %v3669_v7, %v1041_v19  ;;  %v4372_v18 = vld [vmem:[#allocation15] sm:$0xff]  }
 0x29f   : > { %v1057_v24 = vadd.f32 %v1056_v14, %v1055_v8  ;;  %v1071_v25 = vadd.f32 %v1070_v15, %v1069_v9  ;;  %v1062_v26 = vadd.f32 %v1061_v16, %v1060_v10  ;;  %v1076_v27 = vadd.f32 %v1075_v17, %v1074_v11 }
 0x2a0   : > { %v1081_v28 = vadd.f32 %v1080_v20, %v1079_v12  ;;  %v1088_v29 = vadd.f32 %v1087_v21, %v1086_v13  ;;  %v1093_v30 = vsel %vm1050_vm3, %v1048_v22, 0.0  ;;  %v1100_v31 = vsel %vm1050_vm3, %v1049_v23, 0.0  ;;  %v4373_v20 = vld [vmem:[#allocation15 + $0x8] sm:$0xff]   ;;  %v4374_v21 = vld [vmem:[#allocation15 + $0x10] sm:$0xff]   ;;  %v4375_v22 = vld [vmem:[#allocation15 + $0x18] sm:$0xff]  }
 0x2a1   : > { %v1110_v32 = vpack.c.bf16 %v1057_v24, %v1057_v24  ;;  %v1112_v33 = vpack.c.bf16 %v1071_v25, %v1071_v25  ;;  %v1063_v34 = vrot.slane %v1062_v26, 1  ;;  %v1077_v35 = vrot.slane %v1076_v27, 1  ;;  %v4376_v23 = vld [vmem:[#allocation15 + $0x20] sm:$0xff]   ;;  %v4377_v24 = vld [vmem:[#allocation15 + $0x28] sm:$0xff]   ;;  %v4378_v25 = vld [vmem:[#allocation15 + $0x30] sm:$0xff]  }
 0x2a2   : > { %v1082_v36 = vrot.slane %v1081_v28, 2  ;;  %v1089_v37 = vrot.slane %v1088_v29, 2  ;;  %v1094_v38 = vrot.slane %v1093_v30, 4  ;;  %v1101_v39 = vrot.slane %v1100_v31, 4 }
 0x2a3   : > { %v1064_v40 = vadd.f32 %v1063_v34, %v1062_v26  ;;  %v1078_v41 = vadd.f32 %v1077_v35, %v1076_v27  ;;  %v1135_v46 = vunpack.c.l.b16 %v1110_v32  ;;  %v1137_v47 = vunpack.c.l.b16 %v1112_v33  ;;  %v4379_v26 = vld [vmem:[#allocation15 + $0x38] sm:$0xff]  }
 0x2a4   : > { %v1083_v42 = vadd.f32 %v1082_v36, %v1081_v28  ;;  %v1090_v43 = vadd.f32 %v1089_v37, %v1088_v29  ;;  %v1095_v44 = vadd.f32 %v1094_v38, %v1093_v30  ;;  %v1102_v45 = vadd.f32 %v1101_v39, %v1100_v31  ;;  %v3515_v27 = vld [vmem:[#allocation11] ss:$0 sm:$0xff]  ;;  %v3518_v35 = vld [vmem:[#allocation14] ss:$0 sm:$0xff] }
 0x2a5   : > { %v1111_v48 = vpack.c.bf16 %v1064_v40, %v1064_v40  ;;  %v1113_v49 = vpack.c.bf16 %v1078_v41, %v1078_v41  ;;  %v4387_v34 = vld [vmem:[#allocation17 + $0x38] sm:$0xff]   ;;  %v4388_v41 = vld [vmem:[#allocation18] sm:$0xff]  }
 0x2a6   : > { %v1084_v50 = vrot.slane %v1083_v42, 1  ;;  %v1091_v51 = vrot.slane %v1090_v43, 1  ;;  %v1096_v52 = vrot.slane %v1095_v44, 2  ;;  %v1103_v53 = vrot.slane %v1102_v45, 2  ;;  %3871 = vmatpush3.bf16.msra.mxu1 %v4387_v34 }
 0x2a7   : > { %v1136_v54 = vunpack.c.l.b16 %v1111_v48  ;;  %v1138_v55 = vunpack.c.l.b16 %v1113_v49  ;;  %3882 = vmatprep.subr.bf16.mxu1 %v5103_v2  ;;  %v4392_v48 = vld [vmem:[#allocation18 + $0x20] sm:$0xff]   ;;  %v4393_v49 = vld [vmem:[#allocation18 + $0x28] sm:$0xff]  }
 0x2a8   : > { %v1085_v56 = vadd.f32 %v1084_v50, %v1083_v42  ;;  %v1092_v57 = vadd.f32 %v1091_v51, %v1090_v43  ;;  %v1097_v58 = vadd.f32 %v1096_v52, %v1095_v44  ;;  %v1104_v59 = vadd.f32 %v1103_v53, %v1102_v45  ;;  %v4389_v45 = vld [vmem:[#allocation18 + $0x8] sm:$0xff]   ;;  %v4394_v50 = vld [vmem:[#allocation18 + $0x30] sm:$0xff]   ;;  %v4395_v51 = vld [vmem:[#allocation18 + $0x38] sm:$0xff]  }
 0x2a9   : > { %v1144_v60 = vsel %vm1143_vm4, %v1136_v54, %v1135_v46  ;;  %v4390_v46 = vld [vmem:[#allocation18 + $0x10] sm:$0xff]   ;;  %v4396_v52 = vld [vmem:[#allocation17 + $0x40] sm:$0xff]   ;;  %v4397_v53 = vld [vmem:[#allocation17 + $0x48] sm:$0xff]  }
 0x2aa   : > { %v1146_v61 = vsel %vm1145_vm5, %v1137_v47, %v1144_v60  ;;  %v1114_v62 = vpack.c.bf16 %v1085_v56, %v1085_v56  ;;  %v1115_v63 = vpack.c.bf16 %v1092_v57, %v1092_v57  ;;  %v1098_v0 = vrot.slane %v1097_v58, 1  ;;  %v4391_v47 = vld [vmem:[#allocation18 + $0x18] sm:$0xff]   ;;  %v4398_v54 = vld [vmem:[#allocation17 + $0x50] sm:$0xff]   ;;  %v4400_v56 = vld [vmem:[#allocation17 + $0x60] sm:$0xff]  }
 0x2ab   : > { %v1148_v1 = vsel %vm1147_vm6, %v1138_v55, %v1146_v61  ;;  %v1105_v5 = vrot.slane %v1104_v59, 1  ;;  %v4399_v55 = vld [vmem:[#allocation17 + $0x58] sm:$0xff]   ;;  %v4401_v57 = vld [vmem:[#allocation17 + $0x68] sm:$0xff]  }
 0x2ac   : > { %v1139_v6 = vunpack.c.l.b16 %v1114_v62  ;;  %v1140_v7 = vunpack.c.l.b16 %v1115_v63  ;;  %v1099_v8 = vadd.f32 %v1098_v0, %v1097_v58  ;;  %v4402_v58 = vld [vmem:[#allocation17 + $0x70] sm:$0xff]  }
 0x2ad   : > { %v1106_v9 = vadd.f32 %v1105_v5, %v1104_v59  ;;  %v4403_v59 = vld [vmem:[#allocation17 + $0x78] sm:$0xff]  }
 0x2ae   : > { %v1150_v10 = vsel %vm1149_vm7, %v1139_v6, %v1148_v1  ;;  %v1116_v11 = vpack.c.bf16 %v1099_v8, %v1099_v8  ;;  %v4496_v5 = vld [vmem:[%s5679_s6] sm:$0xff]  ;;  %v4405_v8 = vld [vmem:[#allocation15 + $0x48] sm:$0xff]  }
 0x2af   : > { %v1152_v12 = vsel %vm1151_vm8, %v1140_v7, %v1150_v10  ;;  %v1117_v13 = vpack.c.bf16 %v1106_v9, %v1106_v9  ;;  %v5810_v6 = vpack.c.bf16 %v4496_v5, %v4496_v5  ;;  %v4404_v7 = vld [vmem:[#allocation15 + $0x40] sm:$0xff]   ;;  %v4406_v9 = vld [vmem:[#allocation15 + $0x50] sm:$0xff]   ;;  %v4407_v10 = vld [vmem:[#allocation15 + $0x58] sm:$0xff]  }
 0x2b0   : > { %v1141_v14 = vunpack.c.l.b16 %v1116_v11  ;;  %v4408_v11 = vld [vmem:[#allocation15 + $0x60] sm:$0xff]   ;;  %v4433_v5 = vld [vmem:[#allocation15 + $0xa8] sm:$0xff]  }
 0x2b1   : > { %v1142_v15 = vunpack.c.l.b16 %v1117_v13  ;;  %v4410_v13 = vld [vmem:[#allocation15 + $0x70] sm:$0xff]  }
 0x2b2   : > { %v1154_v16 = vsel %vm1153_vm9, %v1141_v14, %v1152_v12  ;;  %v4409_v12 = vld [vmem:[#allocation15 + $0x68] sm:$0xff]   ;;  %v4411_v14 = vld [vmem:[#allocation15 + $0x78] sm:$0xff]  }
 0x2b3   : > { %v1156_v17 = vsel %vm1155_vm10, %v1142_v15, %v1154_v16 }
 0x2b4   : > { %v1157_v19 = vpack.c.b16 %v1156_v17, %v1156_v17 }
 0x2b6   : > { %3833 = vmatmul.mubr.msk.bf16.vlgmr.msra.gmra.mrb[4].mxu0 %vm1050_vm3, %v1157_v19 }
 0x2b7   : > { %3837 = vmatpush3.bf16.msra.mxu0 %v4372_v18  ;;  %3852 = vmatprep.mubr.msk.bf16.mxu0 %vm5104_vm0, %v5103_v2 }
 0x2b8   : > { %3838 = vmatprep.subr.bf16.mxu0 %v5103_v2 }
 0x2bb   : > { %3839 = vmatpush3.bf16.msra.mxu0 %v4373_v20 }
 0x2bc   : > { %3840 = vmatprep.subr.bf16.mxu0 %v5103_v2 }
 0x2bf   : > { %3841 = vmatpush3.bf16.msra.mxu0 %v4374_v21 }
 0x2c0   : > { %3842 = vmatprep.subr.bf16.mxu0 %v5103_v2 }
 0x2c3   : > { %3843 = vmatpush3.bf16.msra.mxu0 %v4375_v22 }
 0x2c4   : > { %3844 = vmatprep.subr.bf16.mxu0 %v5103_v2 }
 0x2c7   : > { %3845 = vmatpush3.bf16.msra.mxu0 %v4376_v23 }
 0x2c8   : > { %3846 = vmatprep.subr.bf16.mxu0 %v5103_v2 }
 0x2cb   : > { %3847 = vmatpush3.bf16.msra.mxu0 %v4377_v24 }
 0x2cc   : > { %3848 = vmatprep.subr.bf16.mxu0 %v5103_v2 }
 0x2cf   : > { %3849 = vmatpush3.bf16.msra.mxu0 %v4378_v25 }
 0x2d0   : > { %3850 = vmatprep.subr.bf16.mxu0 %v5103_v2 }
 0x2d3   : > { %3851 = vmatpush3.bf16.msra.mxu0 %v4379_v26 }
 0x2d4   : > { %3876 = vmatprep.subr.bf16.mxu0 %v5103_v2 }
 0x2d7   : > { %v1109_v36 = vpop.xlane.xlu0 %1108 }
 0x2d8   : > { %v1126_v37 = vmul.f32 %v3518_v35, %v1109_v36 }
 0x2f0   : > { %v964_v28 = vpop.f32.mrb[0].mxu0 }
 0x2f1   : > { %v965_v29 = vadd.f32 %v3515_v27, %v964_v28  ;;  %v3828_v30 = vpop.f32.mrb[1].mxu0 }
 0x2f2   : > { %v967_v31 = vpop.f32.mrb[2].mxu0  ;;  %v3545_v30 = vld [vmem:[#allocation20] ss:$0 sm:$0xff] }
 0x2f3   : > { %v1206_v32 = vpack.c.bf16 %v965_v29, %v965_v29  ;;  %v3829_v33 = vpop.f32.mrb[3].mxu0 }
 0x2f5   : > { %3853 = vmatmul.mubr.bf16.vlgmr.msra.gmra.mrb[8].mxu0 %v1206_v32 }
 0x2f6   : > { %3878 = vmatprep.mubr.msk.bf16.mxu0 %vm5104_vm0, %v5103_v2 }
 0x389   : > { %v1199_v38 = vpop.f32.mrb[4].mxu0 }
 0x38a   : > { %v1200_v39 = vadd.f32 %v1199_v38, %v1126_v37  ;;  %v3834_v40 = vpop.f32.mrb[5].mxu0 }
 0x38b   : > { %v1202_v42 = vpop.f32.mrb[6].mxu0 }
 0x38c   : > { %v5784_v43 = vpack.c.bf16 %v1200_v39, %v1200_v39  ;;  %v3835_v44 = vpop.f32.mrb[7].mxu0 }
 0x38e   : > { %3873 = vmatmul.mubr.bf16.vlgmr.msra.gmra.mrb[0].mxu1 %v5784_v43 }
 0x38f   : > { %3883 = vmatpush3.bf16.msra.mxu1 %v4388_v41  ;;  %3898 = vmatprep.mubr.msk.bf16.mxu1 %vm5104_vm0, %v5103_v2 }
 0x390   : > { %3884 = vmatprep.subr.bf16.mxu1 %v5103_v2 }
 0x393   : > { %3885 = vmatpush3.bf16.msra.mxu1 %v4389_v45  ;;  %v4412_v45 = vld [vmem:[#allocation18 + $0x40] sm:$0xff]  }
 0x394   : > { %3886 = vmatprep.subr.bf16.mxu1 %v5103_v2 }
 0x397   : > { %3887 = vmatpush3.bf16.msra.mxu1 %v4390_v46  ;;  %v4413_v46 = vld [vmem:[#allocation18 + $0x48] sm:$0xff]  }
 0x398   : > { %3888 = vmatprep.subr.bf16.mxu1 %v5103_v2 }
 0x39b   : > { %3889 = vmatpush3.bf16.msra.mxu1 %v4391_v47  ;;  %v4414_v47 = vld [vmem:[#allocation18 + $0x50] sm:$0xff]  }
 0x39c   : > { %3890 = vmatprep.subr.bf16.mxu1 %v5103_v2 }
 0x39f   : > { %3891 = vmatpush3.bf16.msra.mxu1 %v4392_v48  ;;  %v4415_v48 = vld [vmem:[#allocation18 + $0x58] sm:$0xff]  }
 0x3a0   : > { %3892 = vmatprep.subr.bf16.mxu1 %v5103_v2 }
 0x3a3   : > { %3893 = vmatpush3.bf16.msra.mxu1 %v4393_v49  ;;  %v4416_v49 = vld [vmem:[#allocation18 + $0x60] sm:$0xff]  }
 0x3a4   : > { %3894 = vmatprep.subr.bf16.mxu1 %v5103_v2 }
 0x3a7   : > { %3895 = vmatpush3.bf16.msra.mxu1 %v4394_v50  ;;  %v4417_v50 = vld [vmem:[#allocation18 + $0x68] sm:$0xff]  }
 0x3a8   : > { %3896 = vmatprep.subr.bf16.mxu1 %v5103_v2 }
 0x3ab   : > { %3897 = vmatpush3.bf16.msra.mxu1 %v4395_v51  ;;  %v4418_v51 = vld [vmem:[#allocation18 + $0x70] sm:$0xff]  }
 0x3ac   : > { %3922 = vmatprep.subr.bf16.mxu1 %v5103_v2 }
 0x3ae   : > { %3899 = vmatmul.mubr.bf16.vlgmr.msra.gmra.mrb[4].mxu1 %v1206_v32 }
 0x3af   : > { %3923 = vmatpush3.bf16.msra.mxu1 %v4396_v52  ;;  %3938 = vmatprep.mubr.msk.bf16.mxu1 %vm5104_vm0, %v5103_v2  ;;  %v4419_v52 = vld [vmem:[#allocation18 + $0x78] sm:$0xff]  }
 0x3b0   : > { %3924 = vmatprep.subr.bf16.mxu1 %v5103_v2 }
 0x3b3   : > { %3925 = vmatpush3.bf16.msra.mxu1 %v4397_v53  ;;  %v4420_v53 = vld [vmem:[#allocation17 + $0x80] sm:$0xff]  }
 0x3b4   : > { %3926 = vmatprep.subr.bf16.mxu1 %v5103_v2 }
 0x3b7   : > { %3927 = vmatpush3.bf16.msra.mxu1 %v4398_v54  ;;  %v4421_v54 = vld [vmem:[#allocation17 + $0x88] sm:$0xff]  }
 0x3b8   : > { %3928 = vmatprep.subr.bf16.mxu1 %v5103_v2 }
 0x3bb   : > { %3929 = vmatpush3.bf16.msra.mxu1 %v4399_v55  ;;  %v4422_v55 = vld [vmem:[#allocation17 + $0x90] sm:$0xff]  }
 0x3bc   : > { %3930 = vmatprep.subr.bf16.mxu1 %v5103_v2 }
 0x3bf   : > { %3931 = vmatpush3.bf16.msra.mxu1 %v4400_v56  ;;  %v4423_v56 = vld [vmem:[#allocation17 + $0x98] sm:$0xff]  }
 0x3c0   : > { %3932 = vmatprep.subr.bf16.mxu1 %v5103_v2 }
 0x3c3   : > { %3933 = vmatpush3.bf16.msra.mxu1 %v4401_v57  ;;  %v4424_v57 = vld [vmem:[#allocation17 + $0xa0] sm:$0xff]  }
 0x3c4   : > { %3934 = vmatprep.subr.bf16.mxu1 %v5103_v2 }
 0x3c7   : > { %3935 = vmatpush3.bf16.msra.mxu1 %v4402_v58  ;;  %v4425_v58 = vld [vmem:[#allocation17 + $0xa8] sm:$0xff]  }
 0x3c8   : > { %3936 = vmatprep.subr.bf16.mxu1 %v5103_v2  ;;  %v1305_v60 = vpop.f32.mrb[8].mxu0 }
 0x3c9   : > { %v1311_v61 = vpack.c.bf16 %v1305_v60, %v1305_v60  ;;  %v3854_v62 = vpop.f32.mrb[9].mxu0  ;;  %v4427_v60 = vld [vmem:[#allocation17 + $0xb8] sm:$0xff]  }
 0x3ca   : > { %v1308_v63 = vpop.f32.mrb[10].mxu0  ;;  %v4429_v62 = vld [vmem:[#allocation15 + $0x88] sm:$0xff]  }
 0x3cb   : > { %3937 = vmatpush3.bf16.msra.mxu1 %v4403_v59  ;;  %v1420_v0 = vsel %vm1161_vm2, %v1311_v61, 0  ;;  %v3855_v1 = vpop.f32.mrb[11].mxu0  ;;  %v4426_v59 = vld [vmem:[#allocation17 + $0xb0] sm:$0xff]   ;;  %v4428_v61 = vld [vmem:[#allocation15 + $0x80] sm:$0xff]  }
 0x3cc   : > { %3968 = vmatprep.subr.bf16.mxu1 %v5103_v2  ;;  %3877 = vmatpush3.bf16.msra.mxu0 %v1420_v0  ;;  %v4430_v63 = vld [vmem:[#allocation15 + $0x90] sm:$0xff]   ;;  %v4431_v0 = vld [vmem:[#allocation15 + $0x98] sm:$0xff]   ;;  %v4432_v1 = vld [vmem:[#allocation15 + $0xa0] sm:$0xff]  }
 0x3cd   : > { %3902 = vmatprep.subr.bf16.mxu0 %v5103_v2 }
 0x3ce   : > { %3939 = vmatmul.mubr.bf16.vlgmr.msra.gmra.mrb[8].mxu1 %v5784_v43 }
 0x3cf   : > { %3984 = vmatprep.mubr.msk.bf16.mxu1 %vm5104_vm0, %v5103_v2  ;;  %3879 = vmatmul.mubr.msk.bf16.vlgmr.msra.gmra.mrb[12].mxu0 %vm1050_vm3, %v5810_v6 }
 0x3d0   : > { %3918 = vmatprep.mubr.msk.bf16.mxu0 %vm5104_vm0, %v5103_v2  ;;  %3903 = vmatpush3.bf16.msra.mxu0 %v4404_v7  ;;  %v4434_v7 = vld [vmem:[#allocation15 + $0xb0] sm:$0xff]  }
 0x3d1   : > { %3904 = vmatprep.subr.bf16.mxu0 %v5103_v2  ;;  %3969 = vmatpush3.bf16.msra.mxu1 %v4428_v61 }
 0x3d2   : > { %3970 = vmatprep.subr.bf16.mxu1 %v5103_v2 }
 0x3d4   : > { %3905 = vmatpush3.bf16.msra.mxu0 %v4405_v8  ;;  %v4435_v8 = vld [vmem:[#allocation15 + $0xb8] sm:$0xff]  }
 0x3d5   : > { %3906 = vmatprep.subr.bf16.mxu0 %v5103_v2  ;;  %3971 = vmatpush3.bf16.msra.mxu1 %v4429_v62 }
 0x3d6   : > { %3972 = vmatprep.subr.bf16.mxu1 %v5103_v2 }
 0x3d8   : > { %3907 = vmatpush3.bf16.msra.mxu0 %v4406_v9 }
 0x3d9   : > { %3908 = vmatprep.subr.bf16.mxu0 %v5103_v2  ;;  %3973 = vmatpush3.bf16.msra.mxu1 %v4430_v63  ;;  %v4457_v63 = vld [vmem:[#allocation15 + $0xe8] sm:$0xff]  }
 0x3da   : > { %3974 = vmatprep.subr.bf16.mxu1 %v5103_v2 }
 0x3dc   : > { %3909 = vmatpush3.bf16.msra.mxu0 %v4407_v10 }
 0x3dd   : > { %3910 = vmatprep.subr.bf16.mxu0 %v5103_v2  ;;  %3975 = vmatpush3.bf16.msra.mxu1 %v4431_v0  ;;  %v4458_v0 = vld [vmem:[#allocation15 + $0xf0] sm:$0xff]  }
 0x3de   : > { %3976 = vmatprep.subr.bf16.mxu1 %v5103_v2 }
 0x3e0   : > { %3911 = vmatpush3.bf16.msra.mxu0 %v4408_v11 }
 0x3e1   : > { %3912 = vmatprep.subr.bf16.mxu0 %v5103_v2  ;;  %3977 = vmatpush3.bf16.msra.mxu1 %v4432_v1  ;;  %v4459_v1 = vld [vmem:[#allocation15 + $0xf8] sm:$0xff]  }
 0x3e2   : > { %3978 = vmatprep.subr.bf16.mxu1 %v5103_v2 }
 0x3e4   : > { %3913 = vmatpush3.bf16.msra.mxu0 %v4409_v12 }
 0x3e5   : > { %3914 = vmatprep.subr.bf16.mxu0 %v5103_v2  ;;  %3979 = vmatpush3.bf16.msra.mxu1 %v4433_v5 }
 0x3e6   : > { %3980 = vmatprep.subr.bf16.mxu1 %v5103_v2 }
 0x3e8   : > { %3915 = vmatpush3.bf16.msra.mxu0 %v4410_v13 }
 0x3e9   : > { %3916 = vmatprep.subr.bf16.mxu0 %v5103_v2  ;;  %3981 = vmatpush3.bf16.msra.mxu1 %v4434_v7 }
 0x3ea   : > { %3982 = vmatprep.subr.bf16.mxu1 %v5103_v2 }
 0x3ec   : > { %3917 = vmatpush3.bf16.msra.mxu0 %v4411_v14 }
 0x3ed   : > { %3942 = vmatprep.subr.bf16.mxu0 %v5103_v2  ;;  %3983 = vmatpush3.bf16.msra.mxu1 %v4435_v8 }
 0x3ee   : > { %4014 = vmatprep.subr.bf16.mxu1 %v5103_v2 }
 0x461   : > { %v1410_v15 = vpop.f32.mrb[0].mxu1 }
 0x462   : > { %v3874_v16 = vpop.f32.mrb[1].mxu1 }
 0x463   : > { %v1413_v17 = vpop.f32.mrb[2].mxu1 }
 0x464   : > { %v3875_v18 = vpop.f32.mrb[3].mxu1 }
 0x481   : > { %v1560_v19 = vpop.f32.mrb[4].mxu1 }
 0x482   : > { %v3900_v20 = vpop.f32.mrb[5].mxu1 }
 0x483   : > { %v1563_v21 = vpop.f32.mrb[6].mxu1 }
 0x484   : > { %v3901_v22 = vpop.f32.mrb[7].mxu1 }
 0x4a1   : > { %v5827_v23 = vpop.f32.mrb[8].mxu1 }
 0x4a2   : > { %v3940_v24 = vpop.f32.mrb[9].mxu1  ;;  %v1456_v27 = vpop.f32.mrb[12].mxu0 }
 0x4a3   : > { %v1786_v25 = vpop.f32.mrb[10].mxu1  ;;  %v1457_v28 = vadd.f32 %v1456_v27, %v1410_v15  ;;  %v3880_v29 = vpop.f32.mrb[13].mxu0  ;;  %v3571_v15 = vld [vmem:[#allocation20 + $0x1] ss:$0 sm:$0xff]  ;;  %v4439_v27 = vld [vmem:[#allocation18 + $0x98] sm:$0xff]  }
 0x4a4   : > { %v3941_v26 = vpop.f32.mrb[11].mxu1  ;;  %v1459_v31 = vpop.f32.mrb[14].mxu0  ;;  %v4436_v24 = vld [vmem:[#allocation18 + $0x80] sm:$0xff]   ;;  %v4441_v29 = vld [vmem:[#allocation18 + $0xa8] sm:$0xff]  }
 0x4a5   : > { %v1561_v32 = vadd.f32 %v1560_v19, %v1457_v28  ;;  %v3881_v33 = vpop.f32.mrb[15].mxu0  ;;  %v4437_v26 = vld [vmem:[#allocation18 + $0x88] sm:$0xff]   ;;  %v4440_v28 = vld [vmem:[#allocation18 + $0xa0] sm:$0xff]  }
 0x4a7   : > { %v1573_v34 = vadd.f32 %v3545_v30, %v1561_v32  ;;  %v4442_v30 = vld [vmem:[#allocation18 + $0xb0] sm:$0xff]  }
 0x4a9   : > { %vm1574_vm11 = vcmp.gt.f32.partialorder %v1573_v34, 0.0  ;;  %v1575_v35 = vmul.f32 0.01, %v1573_v34 }
 0x4ab   : > { %v1576_v36 = vsel %vm1574_vm11, %v1573_v34, %v1575_v35  ;;  %v4443_v35 = vld [vmem:[#allocation18 + $0xb8] sm:$0xff]  }
 0x4ac   : > { %v1577_v37 = vpack.c.bf16 %v1576_v36, %v1576_v36  ;;  %v4444_v36 = vld [vmem:[#allocation17 + $0xc0] sm:$0xff]  }
 0x4ae   : > { %3919 = vmatmul.mubr.bf16.vlgmr.msra.gmra.mrb[16].mxu0 %v1577_v37 }
 0x4af   : > { %3944 = vmatprep.mubr.msk.bf16.mxu0 %vm5104_vm0, %v5103_v2 }
 0x581   : > { %v1677_v38 = vpop.f32.mrb[16].mxu0 }
 0x582   : > { %v1683_v39 = vpack.c.bf16 %v1677_v38, %v1677_v38  ;;  %v3920_v40 = vpop.f32.mrb[17].mxu0  ;;  %v4446_v38 = vld [vmem:[#allocation17 + $0xd0] sm:$0xff]  }
 0x583   : > { %v1680_v41 = vpop.f32.mrb[18].mxu0  ;;  %v4448_v40 = vld [vmem:[#allocation17 + $0xe0] sm:$0xff]  }
 0x584   : > { %v1790_v42 = vsel %vm1161_vm2, %v1683_v39, 0  ;;  %v3921_v44 = vpop.f32.mrb[19].mxu0  ;;  %v4447_v39 = vld [vmem:[#allocation17 + $0xd8] sm:$0xff]   ;;  %v4449_v41 = vld [vmem:[#allocation17 + $0xe8] sm:$0xff]  }
 0x585   : > { %3943 = vmatpush3.bf16.msra.mxu0 %v1790_v42  ;;  %v4450_v42 = vld [vmem:[#allocation17 + $0xf0] sm:$0xff]   ;;  %v4451_v44 = vld [vmem:[#allocation17 + $0xf8] sm:$0xff]  }
 0x586   : > { %3948 = vmatprep.subr.bf16.mxu0 %v5103_v2 }
 0x588   : > { %3945 = vmatmul.mubr.msk.bf16.vlgmr.msra.gmra.mrb[20].mxu0 %vm1050_vm3, %v5810_v6 }
 0x589   : > { %3949 = vmatpush3.bf16.msra.mxu0 %v4412_v45  ;;  %3964 = vmatprep.mubr.msk.bf16.mxu0 %vm5104_vm0, %v5103_v2 }
 0x58a   : > { %3950 = vmatprep.subr.bf16.mxu0 %v5103_v2 }
 0x58d   : > { %3951 = vmatpush3.bf16.msra.mxu0 %v4413_v46 }
 0x58e   : > { %3952 = vmatprep.subr.bf16.mxu0 %v5103_v2 }
 0x591   : > { %3953 = vmatpush3.bf16.msra.mxu0 %v4414_v47 }
 0x592   : > { %3954 = vmatprep.subr.bf16.mxu0 %v5103_v2 }
 0x595   : > { %3955 = vmatpush3.bf16.msra.mxu0 %v4415_v48 }
 0x596   : > { %3956 = vmatprep.subr.bf16.mxu0 %v5103_v2 }
 0x599   : > { %3957 = vmatpush3.bf16.msra.mxu0 %v4416_v49 }
 0x59a   : > { %3958 = vmatprep.subr.bf16.mxu0 %v5103_v2 }
 0x59d   : > { %3959 = vmatpush3.bf16.msra.mxu0 %v4417_v50 }
 0x59e   : > { %3960 = vmatprep.subr.bf16.mxu0 %v5103_v2 }
 0x5a1   : > { %3961 = vmatpush3.bf16.msra.mxu0 %v4418_v51  ;;  %v4452_v51 = vld [vmem:[#allocation15 + $0xc0] sm:$0xff]  }
 0x5a2   : > { %3962 = vmatprep.subr.bf16.mxu0 %v5103_v2 }
 0x5a5   : > { %3963 = vmatpush3.bf16.msra.mxu0 %v4419_v52  ;;  %v4453_v52 = vld [vmem:[#allocation15 + $0xc8] sm:$0xff]  }
 0x5a6   : > { %3988 = vmatprep.subr.bf16.mxu0 %v5103_v2 }
 0x5a8   : > { %3965 = vmatmul.mubr.bf16.vlgmr.msra.gmra.mrb[24].mxu0 %v1577_v37  ;;  %v4445_v37 = vld [vmem:[#allocation17 + $0xc8] sm:$0xff]  }
 0x5a9   : > { %3989 = vmatpush3.bf16.msra.mxu0 %v4420_v53  ;;  %4004 = vmatprep.mubr.msk.bf16.mxu0 %vm5104_vm0, %v5103_v2  ;;  %v4455_v53 = vld [vmem:[#allocation15 + $0xd8] sm:$0xff]  }
 0x5aa   : > { %3990 = vmatprep.subr.bf16.mxu0 %v5103_v2 }
 0x5ad   : > { %3991 = vmatpush3.bf16.msra.mxu0 %v4421_v54  ;;  %v4456_v54 = vld [vmem:[#allocation15 + $0xe0] sm:$0xff]  }
 0x5ae   : > { %3992 = vmatprep.subr.bf16.mxu0 %v5103_v2 }
 0x5b1   : > { %3993 = vmatpush3.bf16.msra.mxu0 %v4422_v55 }
 0x5b2   : > { %3994 = vmatprep.subr.bf16.mxu0 %v5103_v2 }
 0x5b5   : > { %3995 = vmatpush3.bf16.msra.mxu0 %v4423_v56 }
 0x5b6   : > { %3996 = vmatprep.subr.bf16.mxu0 %v5103_v2 }
 0x5b9   : > { %3997 = vmatpush3.bf16.msra.mxu0 %v4424_v57 }
 0x5ba   : > { %3998 = vmatprep.subr.bf16.mxu0 %v5103_v2 }
 0x5bd   : > { %3999 = vmatpush3.bf16.msra.mxu0 %v4425_v58 }
 0x5be   : > { %4000 = vmatprep.subr.bf16.mxu0 %v5103_v2 }
 0x5c1   : > { %4001 = vmatpush3.bf16.msra.mxu0 %v4426_v59 }
 0x5c2   : > { %4002 = vmatprep.subr.bf16.mxu0 %v5103_v2 }
 0x5c5   : > { %4003 = vmatpush3.bf16.msra.mxu0 %v4427_v60 }
 0x5c6   : > { %4008 = vmatprep.subr.bf16.mxu0 %v5103_v2 }
 0x5c8   : > { %4005 = vmatmul.mubr.bf16.vlgmr.msra.gmra.mrb[28].mxu0 %v5784_v43 }
 0x5c9   : > { %4010 = vmatprep.mubr.msk.bf16.mxu0 %vm5104_vm0, %v5103_v2 }
 0x65b   : > { %v1826_v9 = vpop.f32.mrb[20].mxu0 }
 0x65c   : > { %v1827_v10 = vadd.f32 %v1826_v9, %v5827_v23  ;;  %v3946_v11 = vpop.f32.mrb[21].mxu0  ;;  %v4438_v23 = vld [vmem:[#allocation18 + $0x90] sm:$0xff]   ;;  %v3597_v9 = vld [vmem:[#allocation20 + $0x2] ss:$0 sm:$0xff] }
 0x65d   : > { %v1829_v12 = vpop.f32.mrb[22].mxu0 }
 0x65e   : > { %v3947_v13 = vpop.f32.mrb[23].mxu0 }
 0x67b   : > { %v1931_v14 = vpop.f32.mrb[24].mxu0 }
 0x67c   : > { %v1932_v16 = vadd.f32 %v1931_v14, %v1827_v10  ;;  %v3966_v17 = vpop.f32.mrb[25].mxu0 }
 0x67d   : > { %v1934_v18 = vpop.f32.mrb[26].mxu0 }
 0x67e   : > { %v1945_v19 = vadd.f32 %v3571_v15, %v1932_v16  ;;  %v3967_v20 = vpop.f32.mrb[27].mxu0 }
 0x680   : > { %vm1946_vm12 = vcmp.gt.f32.partialorder %v1945_v19, 0.0  ;;  %v1947_v21 = vmul.f32 0.01, %v1945_v19 }
 0x682   : > { %v1948_v22 = vsel %vm1946_vm12, %v1945_v19, %v1947_v21 }
 0x683   : > { %v1949_v25 = vpack.c.bf16 %v1948_v22, %v1948_v22 }
 0x685   : > { %3985 = vmatmul.mubr.bf16.vlgmr.msra.gmra.mrb[12].mxu1 %v1949_v25 }
 0x686   : > { %4015 = vmatpush3.bf16.msra.mxu1 %v4436_v24  ;;  %4030 = vmatprep.mubr.msk.bf16.mxu1 %vm5104_vm0, %v5103_v2  ;;  %v4460_v24 = vld [vmem:[#allocation18 + $0xc0] sm:$0xff]  }
 0x687   : > { %4016 = vmatprep.subr.bf16.mxu1 %v5103_v2 }
 0x68a   : > { %4017 = vmatpush3.bf16.msra.mxu1 %v4437_v26  ;;  %v4462_v26 = vld [vmem:[#allocation18 + $0xd0] sm:$0xff]  }
 0x68b   : > { %4018 = vmatprep.subr.bf16.mxu1 %v5103_v2 }
 0x68e   : > { %4019 = vmatpush3.bf16.msra.mxu1 %v4438_v23  ;;  %v4463_v23 = vld [vmem:[#allocation18 + $0xd8] sm:$0xff]  }
 0x68f   : > { %4020 = vmatprep.subr.bf16.mxu1 %v5103_v2 }
 0x692   : > { %4021 = vmatpush3.bf16.msra.mxu1 %v4439_v27  ;;  %v4464_v27 = vld [vmem:[#allocation18 + $0xe0] sm:$0xff]  }
 0x693   : > { %4022 = vmatprep.subr.bf16.mxu1 %v5103_v2 }
 0x696   : > { %4023 = vmatpush3.bf16.msra.mxu1 %v4440_v28  ;;  %v4466_v28 = vld [vmem:[#allocation18 + $0xf0] sm:$0xff]  }
 0x697   : > { %4024 = vmatprep.subr.bf16.mxu1 %v5103_v2 }
 0x69a   : > { %4025 = vmatpush3.bf16.msra.mxu1 %v4441_v29  ;;  %v4467_v29 = vld [vmem:[#allocation18 + $0xf8] sm:$0xff]  }
 0x69b   : > { %v5874_v31 = vpop.f32.mrb[28].mxu0  ;;  %4026 = vmatprep.subr.bf16.mxu1 %v5103_v2 }
 0x69c   : > { %v4006_v32 = vpop.f32.mrb[29].mxu0 }
 0x69d   : > { %v2158_v33 = vpop.f32.mrb[30].mxu0 }
 0x69e   : > { %4027 = vmatpush3.bf16.msra.mxu1 %v4442_v30  ;;  %v4007_v34 = vpop.f32.mrb[31].mxu0  ;;  %v2694_v30 = vld [vmem:[#allocation2] sm:$0x1] }
 0x69f   : > { %4028 = vmatprep.subr.bf16.mxu1 %v5103_v2 }
 0x6a2   : > { %4029 = vmatpush3.bf16.msra.mxu1 %v4443_v35 }
 0x6a3   : > { %4054 = vmatprep.subr.bf16.mxu1 %v5103_v2 }
 0x6a5   : > { %4031 = vmatmul.mubr.bf16.vlgmr.msra.gmra.mrb[16].mxu1 %v1949_v25  ;;  %v4461_v25 = vld [vmem:[#allocation18 + $0xc8] sm:$0xff]  }
 0x6a6   : > { %4055 = vmatpush3.bf16.msra.mxu1 %v4444_v36  ;;  %4070 = vmatprep.mubr.msk.bf16.mxu1 %vm5104_vm0, %v5103_v2 }
 0x6a7   : > { %4056 = vmatprep.subr.bf16.mxu1 %v5103_v2 }
 0x6aa   : > { %4057 = vmatpush3.bf16.msra.mxu1 %v4445_v37 }
 0x6ab   : > { %4058 = vmatprep.subr.bf16.mxu1 %v5103_v2 }
 0x6ae   : > { %4059 = vmatpush3.bf16.msra.mxu1 %v4446_v38  ;;  %v3623_v38 = vld [vmem:[#allocation20 + $0x3] ss:$0 sm:$0xff] }
 0x6af   : > { %4060 = vmatprep.subr.bf16.mxu1 %v5103_v2 }
 0x6b2   : > { %4061 = vmatpush3.bf16.msra.mxu1 %v4447_v39 }
 0x6b3   : > { %4062 = vmatprep.subr.bf16.mxu1 %v5103_v2 }
 0x6b6   : > { %4063 = vmatpush3.bf16.msra.mxu1 %v4448_v40 }
 0x6b7   : > { %4064 = vmatprep.subr.bf16.mxu1 %v5103_v2 }
 0x6ba   : > { %4065 = vmatpush3.bf16.msra.mxu1 %v4449_v41 }
 0x6bb   : > { %4066 = vmatprep.subr.bf16.mxu1 %v5103_v2 }
 0x6be   : > { %4067 = vmatpush3.bf16.msra.mxu1 %v4450_v42 }
 0x6bf   : > { %4068 = vmatprep.subr.bf16.mxu1 %v5103_v2 }
 0x6c2   : > { %4069 = vmatpush3.bf16.msra.mxu1 %v4451_v44 }
 0x6c3   : > { %4100 = vmatprep.subr.mxu1 %v5103_v2 }
 0x6c5   : > { %4071 = vmatmul.mubr.bf16.vlgmr.msra.gmra.mrb[20].mxu1 %v5784_v43  ;;  %v4454_v43 = vld [vmem:[#allocation15 + $0xd0] sm:$0xff]  }
 0x6c6   : > { %4102 = vmatprep.mubr.msk.f32.mxu1 %vm5104_vm0, %v5103_v2 }
 0x758   : > { %v2049_v45 = vpop.f32.mrb[12].mxu1 }
 0x759   : > { %v2055_v46 = vpack.c.bf16 %v2049_v45, %v2049_v45  ;;  %v3986_v47 = vpop.f32.mrb[13].mxu1 }
 0x75a   : > { %v2052_v48 = vpop.f32.mrb[14].mxu1  ;;  %v2693_v47 = vld [vmem:[#allocation21] sm:$0x1] }
 0x75b   : > { %v2162_v49 = vsel %vm1161_vm2, %v2055_v46, 0  ;;  %v3987_v50 = vpop.f32.mrb[15].mxu1 }
 0x75c   : > { %4009 = vmatpush3.bf16.msra.mxu0 %v2162_v49 }
 0x75d   : > { %4034 = vmatprep.subr.bf16.mxu0 %v5103_v2 }
 0x75f   : > { %4011 = vmatmul.mubr.msk.bf16.vlgmr.msra.gmra.mrb[32].mxu0 %vm1050_vm3, %v5810_v6 }
 0x760   : > { %4035 = vmatpush3.bf16.msra.mxu0 %v4452_v51  ;;  %4050 = vmatprep.mubr.msk.bf16.mxu0 %vm5104_vm0, %v5103_v2 }
 0x761   : > { %4036 = vmatprep.subr.bf16.mxu0 %v5103_v2 }
 0x764   : > { %4037 = vmatpush3.bf16.msra.mxu0 %v4453_v52 }
 0x765   : > { %4038 = vmatprep.subr.bf16.mxu0 %v5103_v2 }
 0x768   : > { %4039 = vmatpush3.bf16.msra.mxu0 %v4454_v43 }
 0x769   : > { %4040 = vmatprep.subr.bf16.mxu0 %v5103_v2 }
 0x76c   : > { %4041 = vmatpush3.bf16.msra.mxu0 %v4455_v53 }
 0x76d   : > { %4042 = vmatprep.subr.bf16.mxu0 %v5103_v2 }
 0x770   : > { %4043 = vmatpush3.bf16.msra.mxu0 %v4456_v54 }
 0x771   : > { %4044 = vmatprep.subr.bf16.mxu0 %v5103_v2 }
 0x774   : > { %4045 = vmatpush3.bf16.msra.mxu0 %v4457_v63  ;;  %v4470_v63 = vld [vmem:[#allocation23 + $0x10] sm:$0xff]  }
 0x775   : > { %4046 = vmatprep.subr.bf16.mxu0 %v5103_v2 }
 0x778   : > { %v2303_v55 = vpop.f32.mrb[16].mxu1  ;;  %4047 = vmatpush3.bf16.msra.mxu0 %v4458_v0  ;;  %v4471_v0 = vld [vmem:[#allocation23 + $0x18] sm:$0xff]  }
 0x779   : > { %v4032_v56 = vpop.f32.mrb[17].mxu1  ;;  %4048 = vmatprep.subr.bf16.mxu0 %v5103_v2 }
 0x77a   : > { %v2306_v57 = vpop.f32.mrb[18].mxu1 }
 0x77b   : > { %v4033_v58 = vpop.f32.mrb[19].mxu1 }
 0x77c   : > { %4049 = vmatpush3.bf16.msra.mxu0 %v4459_v1  ;;  %v4472_v1 = vld [vmem:[#allocation23 + $0x20] sm:$0xff]  }
 0x77d   : > { %4074 = vmatprep.subr.bf16.mxu0 %v5103_v2 }
 0x798   : > { %v5903_v59 = vpop.f32.mrb[20].mxu1 }
 0x799   : > { %v4072_v60 = vpop.f32.mrb[21].mxu1 }
 0x79a   : > { %v2530_v61 = vpop.f32.mrb[22].mxu1  ;;  %v4468_v60 = vld [vmem:[#allocation23] sm:$0xff]  }
 0x79b   : > { %v4073_v62 = vpop.f32.mrb[23].mxu1 }
 0x79c   : > { %v4469_v62 = vld [vmem:[#allocation23 + $0x8] sm:$0xff]  }
 0x832   : > { %v2198_v5 = vpop.f32.mrb[32].mxu0 }
 0x833   : > { %v2199_v7 = vadd.f32 %v2198_v5, %v5874_v31  ;;  %v4012_v8 = vpop.f32.mrb[33].mxu0  ;;  %v5105_v31 = vmov 0   ;;  %v4473_v5 = vld [vmem:[#allocation23 + $0x28] sm:$0xff]  }
 0x834   : > { %v2201_v10 = vpop.f32.mrb[34].mxu0  ;;  %4369 = vset.pattern.permute.xlu1 %v5105_v31  ;;  %4370 = vset.pattern.permute.xlu0 %v5105_v31  ;;  %v4475_v8 = vld [vmem:[#allocation23 + $0x38] sm:$0xff]  }
 0x835   : > { %v2304_v11 = vadd.f32 %v2303_v55, %v2199_v7  ;;  %v4013_v12 = vpop.f32.mrb[35].mxu0  ;;  %2697 = vperm.xlu1 %4369, %v2694_v30   ;;  %v4474_v7 = vld [vmem:[#allocation23 + $0x30] sm:$0xff]  }
 0x836   : > { %v4477_v10 = vld [vmem:[#allocation26 + $0x8] sm:$0xff]   ;;  %v4479_v12 = vld [vmem:[#allocation26 + $0x18] sm:$0xff]  }
 0x837   : > { %v2317_v13 = vadd.f32 %v3597_v9, %v2304_v11  ;;  %v4476_v9 = vld [vmem:[#allocation26] sm:$0xff]   ;;  %v4478_v11 = vld [vmem:[#allocation26 + $0x10] sm:$0xff]  }
 0x839   : > { %vm2318_vm13 = vcmp.gt.f32.partialorder %v2317_v13, 0.0  ;;  %v2319_v14 = vmul.f32 0.01, %v2317_v13 }
 0x83b   : > { %v2320_v15 = vsel %vm2318_vm13, %v2317_v13, %v2319_v14  ;;  %v4480_v13 = vld [vmem:[#allocation26 + $0x20] sm:$0xff]   ;;  %v4481_v14 = vld [vmem:[#allocation26 + $0x28] sm:$0xff]  }
 0x83c   : > { %v2321_v16 = vpack.c.bf16 %v2320_v15, %v2320_v15 }
 0x83e   : > { %4051 = vmatmul.mubr.bf16.vlgmr.msra.gmra.mrb[36].mxu0 %v2321_v16 }
 0x83f   : > { %4076 = vmatprep.mubr.msk.bf16.mxu0 %vm5104_vm0, %v5103_v2 }
 0x8b4   : > { %v2698_v48 = vpop.permute.xlu1 %2697 }
 0x8b5   : > { %v2703_v49 = vrot.slane %v2698_v48, %v988_v4 }
 0x911   : > { %v2421_v17 = vpop.f32.mrb[36].mxu0 }
 0x912   : > { %v2427_v18 = vpack.c.bf16 %v2421_v17, %v2421_v17  ;;  %v4052_v19 = vpop.f32.mrb[37].mxu0 }
 0x913   : > { %v2424_v20 = vpop.f32.mrb[38].mxu0  ;;  %v4483_v19 = vld [vmem:[#allocation26 + $0x38] sm:$0xff]  }
 0x914   : > { %v2534_v21 = vsel %vm1161_vm2, %v2427_v18, 0  ;;  %v4053_v22 = vpop.f32.mrb[39].mxu0  ;;  %v4482_v18 = vld [vmem:[#allocation26 + $0x30] sm:$0xff]  }
 0x915   : > { %4075 = vmatpush3.bf16.msra.mxu0 %v2534_v21  ;;  %v4484_v20 = vld [vmem:[%s6199_s0] sm:$0xff]   ;;  %v4485_v21 = vld [vmem:[%s6199_s0 + $0x8] sm:$0xff]   ;;  %v4486_v22 = vld [vmem:[%s6199_s0 + $0x10] sm:$0xff]  }
 0x916   : > { %4080 = vmatprep.subr.bf16.mxu0 %v5103_v2 }
 0x918   : > { %4077 = vmatmul.mubr.msk.bf16.vlgmr.msra.gmra.mrb[40].mxu0 %vm1050_vm3, %v5810_v6  ;;  %v4465_v6 = vld [vmem:[#allocation18 + $0xe8] sm:$0xff]  }
 0x919   : > { %4081 = vmatpush3.bf16.msra.mxu0 %v4460_v24  ;;  %4096 = vmatprep.mubr.msk.bf16.mxu0 %vm5104_vm0, %v5103_v2  ;;  %v4487_v24 = vld [vmem:[%s6199_s0 + $0x18] sm:$0xff]  }
 0x91a   : > { %4082 = vmatprep.subr.bf16.mxu0 %v5103_v2 }
 0x91d   : > { %4083 = vmatpush3.bf16.msra.mxu0 %v4461_v25  ;;  %v4488_v25 = vld [vmem:[%s6199_s0 + $0x20] sm:$0xff]  }
 0x91e   : > { %4084 = vmatprep.subr.bf16.mxu0 %v5103_v2 }
 0x921   : > { %4085 = vmatpush3.bf16.msra.mxu0 %v4462_v26  ;;  %v4489_v26 = vld [vmem:[%s6199_s0 + $0x28] sm:$0xff]  }
 0x922   : > { %4086 = vmatprep.subr.bf16.mxu0 %v5103_v2 }
 0x925   : > { %4087 = vmatpush3.bf16.msra.mxu0 %v4463_v23  ;;  %v2879_v23 = vld [vmem:[#allocation24] sm:$0x1] }
 0x926   : > { %4088 = vmatprep.subr.bf16.mxu0 %v5103_v2 }
 0x929   : > { %4089 = vmatpush3.bf16.msra.mxu0 %v4464_v27 }
 0x92a   : > { %4090 = vmatprep.subr.bf16.mxu0 %v5103_v2 }
 0x92d   : > { %4091 = vmatpush3.bf16.msra.mxu0 %v4465_v6 }
 0x92e   : > { %4092 = vmatprep.subr.bf16.mxu0 %v5103_v2 }
 0x931   : > { %4093 = vmatpush3.bf16.msra.mxu0 %v4466_v28 }
 0x932   : > { %4094 = vmatprep.subr.bf16.mxu0 %v5103_v2 }
 0x935   : > { %4095 = vmatpush3.bf16.msra.mxu0 %v4467_v29 }
 0x936   : > { %4130 = vmatprep.subr.bf16.mxu0 %v5103_v2 }
 0x938   : > { %4097 = vmatmul.mubr.bf16.vlgmr.msra.gmra.mrb[44].mxu0 %v2321_v16 }
 0x939   : > { %4146 = vmatprep.mubr.msk.bf16.mxu0 %vm5104_vm0, %v5103_v2  ;;  %4131 = vmatpush3.bf16.msra.mxu0 %v4476_v9 }
 0x93a   : > { %4132 = vmatprep.subr.bf16.mxu0 %v5103_v2 }
 0x93d   : > { %4133 = vmatpush3.bf16.msra.mxu0 %v4477_v10 }
 0x93e   : > { %4134 = vmatprep.subr.bf16.mxu0 %v5103_v2 }
 0x941   : > { %4135 = vmatpush3.bf16.msra.mxu0 %v4478_v11 }
 0x942   : > { %4136 = vmatprep.subr.bf16.mxu0 %v5103_v2 }
 0x945   : > { %4137 = vmatpush3.bf16.msra.mxu0 %v4479_v12 }
 0x946   : > { %4138 = vmatprep.subr.bf16.mxu0 %v5103_v2 }
 0x949   : > { %4139 = vmatpush3.bf16.msra.mxu0 %v4480_v13 }
 0x94a   : > { %4140 = vmatprep.subr.bf16.mxu0 %v5103_v2 }
 0x94d   : > { %4141 = vmatpush3.bf16.msra.mxu0 %v4481_v14 }
 0x94e   : > { %4142 = vmatprep.subr.bf16.mxu0 %v5103_v2 }
 0x951   : > { %4143 = vmatpush3.bf16.msra.mxu0 %v4482_v18 }
 0x952   : > { %4144 = vmatprep.subr.bf16.mxu0 %v5103_v2 }
 0x955   : > { %4145 = vmatpush3.bf16.msra.mxu0 %v4483_v19 }
 0x9eb   : > { %v2570_v32 = vpop.f32.mrb[40].mxu0 }
 0x9ec   : > { %v2571_v33 = vadd.f32 %v2570_v32, %v5903_v59  ;;  %v4078_v34 = vpop.f32.mrb[41].mxu0 }
 0x9ed   : > { %v2573_v35 = vpop.f32.mrb[42].mxu0  ;;  %v4491_v34 = vld [vmem:[%s6199_s0 + $0x38] sm:$0xff]  }
 0x9ee   : > { %v4079_v36 = vpop.f32.mrb[43].mxu0  ;;  %v2986_v35 = vld [vmem:[#allocation27] sm:$0x1] }
 0xa0b   : > { %v2675_v37 = vpop.f32.mrb[44].mxu0 }
 0xa0c   : > { %v2676_v39 = vadd.f32 %v2675_v37, %v2571_v33  ;;  %v4098_v40 = vpop.f32.mrb[45].mxu0  ;;  %v4490_v33 = vld [vmem:[%s6199_s0 + $0x30] sm:$0xff]  }
 0xa0d   : > { %v2678_v41 = vpop.f32.mrb[46].mxu0 }
 0xa0e   : > { %v2689_v42 = vadd.f32 %v3623_v38, %v2676_v39  ;;  %v4099_v44 = vpop.f32.mrb[47].mxu0 }
 0xa10   : > { %v2691_v45 = vmul.f32 0.01, %v2689_v42  ;;  %vm2690_vm14 = vcmp.gt.f32.partialorder %v2689_v42, 0.0 }
 0xa12   : > { %v2692_v46 = vsel %vm2690_vm14, %v2689_v42, %v2691_v45 }
 0xa13   : > { %4101 = vmatpush3.xpose.msra.mxu1 %v2692_v46 }
 0xa14   : > { %4105 = vmatprep.subr.mxu1 %v5103_v2 }
 0xa16   : > { %4103 = vmatmul.mubr.f32.vlgmr.msra.gmra.mrb[24].mxu1 %v2693_v47 }
 0xa17   : > { %4106 = vmatpush3.msra.mxu1 %v2692_v46  ;;  %4107 = vmatprep.mubr.msk.f32.mxu1 %vm5104_vm0, %v5103_v2 }
 0xa18   : > { %4110 = vmatprep.subr.bf16.mxu1 %v5103_v2 }
 0xae9   : > { %v2770_v50 = vpop.f32.mrb[24].mxu1 }
 0xaea   : > { %v2771_v51 = vadd.f32 %v2770_v50, %v2703_v49  ;;  %v4104_v52 = vpop.f32.mrb[25].mxu1 }
 0xaec   : > { %v2775_v43 = vmul.f32 0.01, %v2771_v51  ;;  %vm2774_vm15 = vcmp.gt.f32.partialorder %v2771_v51, 0.0 }
 0xaee   : > { %v2776_v53 = vsel %vm2774_vm15, %v2771_v51, %v2775_v43 }
 0xaef   : > { %v2778_v54 = vsel %vm2777_vm1, %v2776_v53, -inf }
 0xaf0   : > { %2779 = vmax.xlane.f32.xlu1 %v2778_v54 }
 0xb7d   : > { %v2780_v55 = vpop.xlane.xlu1 %2779 }
 0xb7e   : > { %v2781_v56 = vsub.f32 %v2776_v53, %v2780_v55 }
 0xb80   : > { %v2782_v57 = vmul.f32 1.442695, %v2781_v56 }
 0xb82   : > { %4492 = vpow2.f32 %v2782_v57 }
 0xb8c   : > { %v4493_v58 = vpop.eup %4492 }
 0xb8d   : > { %v2784_v3 = vsel %vm2777_vm1, %v4493_v58, 0.0 }
 0xb8e   : > { %2785 = vadd.xlane.f32.xlu0 %v2784_v3 }
 0xc1b   : > { %v2786_v4 = vpop.xlane.xlu0 %2785 }
 0xc1c   : > { %4494 = vrcp.f32 %v2786_v4 }
 0xc26   : > { %v4495_v59 = vpop.eup %4494 }
 0xc27   : > { %v2788_v61 = vmul.f32 %v4495_v59, %v4493_v58 }
 0xc29   : > { %4108 = vmatmul.mubr.msk.f32.vlgmr.msra.gmra.mrb[26].mxu1 %vm1050_vm3, %v2788_v61  ;;  %3183 = vst.msk [vmem:[%s906_s18] sm:$0x1] %vm2777_vm1, %v2788_v61 }
 0xc2a   : > { %4111 = vmatpush3.bf16.msra.mxu1 %v4468_v60  ;;  %4126 = vmatprep.mubr.msk.bf16.mxu1 %vm5104_vm0, %v5103_v2 }
 0xc2b   : > { %4112 = vmatprep.subr.bf16.mxu1 %v5103_v2 }
 0xc2e   : > { %4113 = vmatpush3.bf16.msra.mxu1 %v4469_v62 }
 0xc2f   : > { %4114 = vmatprep.subr.bf16.mxu1 %v5103_v2 }
 0xc32   : > { %4115 = vmatpush3.bf16.msra.mxu1 %v4470_v63 }
 0xc33   : > { %4116 = vmatprep.subr.bf16.mxu1 %v5103_v2 }
 0xc36   : > { %4117 = vmatpush3.bf16.msra.mxu1 %v4471_v0 }
 0xc37   : > { %4118 = vmatprep.subr.bf16.mxu1 %v5103_v2 }
 0xc3a   : > { %4119 = vmatpush3.bf16.msra.mxu1 %v4472_v1 }
 0xc3b   : > { %4120 = vmatprep.subr.bf16.mxu1 %v5103_v2 }
 0xc3e   : > { %4121 = vmatpush3.bf16.msra.mxu1 %v4473_v5 }
 0xc3f   : > { %4122 = vmatprep.subr.bf16.mxu1 %v5103_v2 }
 0xc42   : > { %4123 = vmatpush3.bf16.msra.mxu1 %v4474_v7 }
 0xc43   : > { %4124 = vmatprep.subr.bf16.mxu1 %v5103_v2 }
 0xc46   : > { %4125 = vmatpush3.bf16.msra.mxu1 %v4475_v8 }
 0xc47   : > { %4150 = vmatprep.subr.bf16.mxu1 %v5103_v2 }
 0xcfc   : > { %v2858_v15 = vpop.f32.mrb[26].mxu1 }
 0xcfd   : > { %v2862_v16 = vpack.c.bf16 %v2858_v15, %v2858_v15  ;;  %v4109_v17 = vpop.f32.mrb[27].mxu1 }
 0xcff   : > { %4127 = vmatmul.mubr.bf16.vlgmr.msra.gmra.mrb[28].mxu1 %v2862_v16 }
 0xd00   : > { %4166 = vmatprep.mubr.msk.bf16.mxu1 %vm5104_vm0, %v5103_v2  ;;  %4151 = vmatpush3.bf16.msra.mxu1 %v4484_v20 }
 0xd01   : > { %4152 = vmatprep.subr.bf16.mxu1 %v5103_v2 }
 0xd04   : > { %4153 = vmatpush3.bf16.msra.mxu1 %v4485_v21 }
 0xd05   : > { %4154 = vmatprep.subr.bf16.mxu1 %v5103_v2 }
 0xd08   : > { %4155 = vmatpush3.bf16.msra.mxu1 %v4486_v22 }
 0xd09   : > { %4156 = vmatprep.subr.bf16.mxu1 %v5103_v2 }
 0xd0c   : > { %4157 = vmatpush3.bf16.msra.mxu1 %v4487_v24 }
 0xd0d   : > { %4158 = vmatprep.subr.bf16.mxu1 %v5103_v2 }
 0xd10   : > { %4159 = vmatpush3.bf16.msra.mxu1 %v4488_v25 }
 0xd11   : > { %4160 = vmatprep.subr.bf16.mxu1 %v5103_v2 }
 0xd14   : > { %4161 = vmatpush3.bf16.msra.mxu1 %v4489_v26 }
 0xd15   : > { %4162 = vmatprep.subr.bf16.mxu1 %v5103_v2 }
 0xd18   : > { %4163 = vmatpush3.bf16.msra.mxu1 %v4490_v33 }
 0xd19   : > { %4164 = vmatprep.subr.bf16.mxu1 %v5103_v2 }
 0xd1c   : > { %4165 = vmatpush3.bf16.msra.mxu1 %v4491_v34 }
 0xdd2   : > { %v2962_v27 = vpop.f32.mrb[28].mxu1 }
 0xdd3   : > { %v2963_v6 = vadd.f32 %v2962_v27, %v2879_v23  ;;  %v4128_v28 = vpop.f32.mrb[29].mxu1 }
 0xdd4   : > { %v2965_v29 = vpop.f32.mrb[30].mxu1 }
 0xdd5   : > { %v2968_v30 = vmax.f32 %v2963_v6, 0.0  ;;  %v4129_v31 = vpop.f32.mrb[31].mxu1 }
 0xdd7   : > { %v2969_v32 = vpack.c.bf16 %v2968_v30, %v2968_v30 }
 0xdd9   : > { %4147 = vmatmul.mubr.bf16.vlgmr.msra.gmra.mrb[48].mxu0 %v2969_v32 }
 0xeac   : > { %v3069_v36 = vpop.f32.mrb[48].mxu0 }
 0xead   : > { %v3070_v37 = vadd.f32 %v3069_v36, %v2986_v35  ;;  %v4148_v38 = vpop.f32.mrb[49].mxu0 }
 0xeae   : > { %v3072_v39 = vpop.f32.mrb[50].mxu0 }
 0xeaf   : > { %v3075_v40 = vmax.f32 %v3070_v37, 0.0  ;;  %v4149_v41 = vpop.f32.mrb[51].mxu0 }
 0xeb1   : > { %v3076_v42 = vpack.c.bf16 %v3075_v40, %v3075_v40 }
 0xeb3   : > { %4167 = vmatmul.mubr.bf16.vlgmr.msra.gmra.mrb[32].mxu1 %v3076_v42 }
 0xeb4   : > { %4964 = shalt.err (!%p4961_p5)
}
 0xeb5   : > { %s4965_s18 = scalar_lea.hbm %s5997_s29, 16  ;;  %s4969_s6 = scalar_lea.hbm %s6200_s16, 64 }
 0xeb6   : > { %p4966_p11 = scmp.ne.s32.totalorder %s5997_s29, %s4965_s18  ;;  %p4970_p10 = scmp.lt.u32.totalorder %s5997_s29, %s6200_s16 }
 0xeb7   : > { %p4971_p13 = scmp.lt.u32.totalorder %s4969_s6, %s4965_s18  ;;  %p4973_p12 = scmp.lt.u32.totalorder %s4965_s18, %s5997_s29 }
 0xeb8   : > { %p4967_p1 = pnand %p4966_p11, %p6201_p3 }
 0xeb9   : > { %p4972_p2 = por %p4971_p13, %p4970_p10 }
 0xeba   : > { %p4968_p9 = pneg %p4967_p1 }
 0xebb   : > { %p4974_p0 = por %p4973_p12, %p4972_p2 }
 0xebd   : > { %p4975_p4 = pnand %p4974_p0, %p4968_p9 }
 0xebf   : > { %4978 = shalt.err (!%p4975_p4)
}
 0xec0   : > { %4229 = dma.vmem_to_hbm [thread:$0]  (%p6201_p3), %s3215_s3, 16, %s5997_s29, %s3189_s8  }
 0xec1   : > { %s6202_s20 = sld [smem:[#allocation64_spill]]  ;;  %s900_s5 = scalar_lea.vmem [#allocation29], %s5675_s15 }
 0xec2   : > { %s3201_s28 = sshll.u32 %s900_s5, 4  ;;  %s6203_s14 = sld [smem:[#allocation65_spill]]  ;;  %s6030_s28 = int_to_ptr.vmem [resolvable:$true] %s3201_s28 }
 0xec3   : > { %s3185_s29 = scalar_lea.sflag [#allocation5], %s5675_s15  ;;  %s4979_s3 = scalar_lea.vmem %s6030_s28, 16 }
 0xec4   : > { %p4980_p8 = scmp.ne.s32.totalorder %s6030_s28, %s4979_s3  ;;  %s5107_s26 = smov [#allocation29]  }
 0xec5   : > { %s4983_s8 = sshll.u32 %s5107_s26, 4  ;;  %s4984_s8 = int_to_ptr.vmem [resolvable:$false] %s4983_s8 }
 0xec6   : > { %p4981_p7 = pnand %p4980_p8, %p6201_p3  ;;  %s4985_s22 = scalar_lea.vmem %s4984_s8, 32 }
 0xec7   : > { %v3093_v2 = vld [vmem:[%s6202_s20] sm:$0x1]  ;;  %p4986_p5 = scmp.lt.s32.totalorder %s6030_s28, %s4984_s8  ;;  %p4987_p11 = scmp.lt.s32.totalorder %s4985_s22, %s4979_s3 }
 0xec8   : > { %s6028_s18 = scalar_lea.hbm %s6203_s14, %s3649_s1  ;;  %p4982_p6 = pneg %p4981_p7 }
 0xec9   : > { %p4988_p1 = por %p4987_p11, %p4986_p5 }
 0xecb   : > { %p4989_p9 = pnand %p4988_p1, %p4982_p6 }
 0xf86   : > { %v3176_v44 = vpop.f32.mrb[32].mxu1 }
 0xf87   : > { %v3177_v45 = vadd.f32 %v3176_v44, %v3093_v2  ;;  %v4168_v46 = vpop.f32.mrb[33].mxu1 }
 0xf88   : > { %v3179_v47 = vpop.f32.mrb[34].mxu1 }
 0xf89   : > { %3182 = vst [vmem:[%s900_s5] sm:$0x1] %v3177_v45  ;;  %v4169_v48 = vpop.f32.mrb[35].mxu1 }
 0xf8a   : > { %4992 = shalt.err (!%p4989_p9)
}
 0xf8b   : > { %s4993_s15 = scalar_lea.hbm %s6028_s18, 16  ;;  %s4997_s6 = scalar_lea.hbm %s6203_s14, 64 }
 0xf8c   : > { %p4994_p10 = scmp.ne.s32.totalorder %s6028_s18, %s4993_s15  ;;  %p4998_p12 = scmp.lt.u32.totalorder %s6028_s18, %s6203_s14 }
 0xf8d   : > { %p4999_p0 = scmp.lt.u32.totalorder %s4997_s6, %s4993_s15  ;;  %p5001_p8 = scmp.lt.u32.totalorder %s4993_s15, %s6028_s18 }
 0xf8e   : > { %p4995_p13 = pnand %p4994_p10, %p6201_p3 }
 0xf8f   : > { %p5000_p4 = por %p4999_p0, %p4998_p12 }
 0xf90   : > { %p4996_p2 = pneg %p4995_p13 }
 0xf91   : > { %p5002_p7 = por %p5001_p8, %p5000_p4 }
 0xf93   : > { %p5003_p6 = pnand %p5002_p7, %p4996_p2 }
 0xf95   : > { %5006 = shalt.err (!%p5003_p6)
}
 0xf96   : > { %4228 = dma.vmem_to_hbm [thread:$0]  (%p6201_p3), %s6030_s28, 16, %s6028_s18, %s3185_s29  }
 0xf97 PF: > { %s6204_s12 = sld [smem:[#allocation43_spill]]  ;;  %s6205_s30 = sld [smem:[#allocation48_spill]] }
 0xf98   : > { %p4316_p5 = scmp.ge.s32.totalorder %s5081_s2, 2 }
 0xf9d   : > { %s3226_s20 = sand.u32 1, %s6204_s12   ;;  %p6206_p11 = scmp.ne.s32.totalorder %s6205_s30, 0 }
 0xf9e   : > { %s3227_s5 = scalar_lea.sflag [#allocation5], %s3226_s20 }
 0xf9f   : > { %p4283_p1 = pnand %p4316_p5, %p6206_p11 }
 0xfa1   : > { %5060 = dma.done.wait (!%p4283_p1), %s3227_s5, 16  }
 0xfa2   : > { %5062 = vsyncadd (!%p4283_p1), %s3227_s5, 4294967280  ;;  %s3235_s23 = scalar_lea.sflag [#allocation31], %s3226_s20 }
 0xfa3   : > { %5064 = dma.done.wait (!%p4283_p1), %s3235_s23, 16  }
 0xfa4   : > { %5066 = vsyncadd (!%p4283_p1), %s3235_s23, 4294967280  ;;  %s6207_s2 = sld [smem:[#allocation46_spill]]  ;;  %s6208_s4 = sld [smem:[#allocation44_spill]] }
 0xfa5   : > { %s6209_s12 = sld [smem:[#allocation47_spill]]  ;;  %s6210_s23 = smov %s5073_s24 }
 0xfaa   : > { %p49_p3 = scmp.ge.s32.totalorder %s6207_s2, 6   ;;  %s6211_s24 = smov %s6208_s4 }
 0xfac   :  { %51 = sbr.rel (!%p49_p3) target bundleno = 35 (0x23), region = 246 }
 0xfb3   :  { %3239 = vsyncpa [#allocation4], 1 }
 0xfb4   :  { %3241 = vsyncpa [#allocation4 + $0x1], 1 }
 0xfb5   :  { %3242 = vsyncpa [#allocation7], 1 }
 0xfb6   :  { %3244 = vsyncpa [#allocation7 + $0x1], 1 }
 0xfb7   :  { %3245 = vsyncpa [#allocation10], 1 }
 0xfb8   :  { %3246 = vsyncpa [#allocation13], 1 }
 0xfb9   :  { %3247 = vsyncpa [#allocation16], 1 }
 0xfba   :  { %3248 = vsyncpa [#allocation19], 1 }
 0xfbb   :  { %3249 = vsyncpa [#allocation22], 1 }
 0xfbc   :  { %3250 = vsyncpa [#allocation25], 1 }
 0xfbd   :  { %3251 = vsyncpa [#allocation28], 1 }
 0xfbe   :  { %3252 = vsyncpa [#allocation5], 1 }
 0xfbf   :  { %3254 = vsyncpa [#allocation5 + $0x1], 1 }
 0xfc0   :  { %3255 = vsyncpa [#allocation31], 1 }
 0xfc1   :  { %3257 = vsyncpa [#allocation31 + $0x1], 1 }

</bundles_post_ra>
